<compile_context>
chip_gen: v6e
topology: v6e:2x2x1
jax: 0.10.0
libtpu: 0.0.40
codegen_flags: <defaults>
</compile_context>

<pallas_src>
import math

import jax
import jax.numpy as jnp
import numpy as np
from jax import lax
from jax.experimental import pallas as pl
from jax.experimental.pallas import tpu as pltpu

LAYER_NORM_EPS = 1e-12
BF16 = jnp.bfloat16


def _layernorm(x, g, b, eps=LAYER_NORM_EPS):
    mu = jnp.mean(x, axis=-1, keepdims=True)
    var = jnp.mean(jnp.square(x - mu), axis=-1, keepdims=True)
    return (x - mu) * lax.rsqrt(var + eps) * g + b


def _erf_approx(x):
    # Abramowitz & Stegun 7.1.26 (max abs err ~1.5e-7); uses only exp / div / where.
    a1, a2, a3, a4, a5 = 0.254829592, -0.284496736, 1.421413741, -1.453152027, 1.061405429
    p = 0.3275911
    ax = jnp.abs(x)
    t = 1.0 / (1.0 + p * ax)
    poly = t * (a1 + t * (a2 + t * (a3 + t * (a4 + t * a5))))
    y = 1.0 - poly * jnp.exp(-ax * ax)
    return jnp.where(x >= 0.0, y, -y)


def _gelu_exact(x):
    return 0.5 * x * (1.0 + _erf_approx(x * (1.0 / math.sqrt(2.0))))


# --------------------------------------------------------------------------------------
# Fused Pallas kernel: embedding (l == 0) + one BERT layer per grid step along L.
# --------------------------------------------------------------------------------------
def make_fused_kernel(num_heads, head_dim, hidden):
    scale = 1.0 / math.sqrt(head_dim)
    D = hidden

    def kernel(x_ref, mask_ref, pe_ref,
               eg1_ref, eb1_ref, ew_ref, ebw_ref, eg2_ref, eb2_ref,
               wqkv_ref, bqkv_ref, wao_ref, bao_ref, lnag_ref, lnab_ref,
               wi_ref, bi_ref, wo_ref, bo_ref, lnog_ref, lnob_ref,
               h_ref):
        layer = pl.program_id(1)

        # ---- video_embeddings + PositionEncoding, once per batch element -------------
        @pl.when(layer == 0)
        def _():
            xf = x_ref[0]                                             # (N, Dfeat) f32
            xn = _layernorm(xf, eg1_ref[...], eb1_ref[...])
            emb = jnp.dot(xn.astype(BF16), ew_ref[...],
                          preferred_element_type=jnp.float32) + ebw_ref[...]
            emb = jnp.maximum(emb, 0.0)                               # ReLU(True)
            emb = _layernorm(emb, eg2_ref[...], eb2_ref[...])
            h_ref[0] = emb + pe_ref[...]                              # sinusoidal PE

        # ---- one BertLayerUntied on the VMEM-resident hidden state -------------------
        x = h_ref[0]                                                  # (N, D) f32
        xb = x.astype(BF16)
        mask_bias = (1.0 - mask_ref[0]) * -10000.0                    # (1, N), masks keys

        # fused QKV projection: one (N, D) @ (D, 3D) MXU dot
        qkv = jnp.dot(xb, wqkv_ref[0], preferred_element_type=jnp.float32) + bqkv_ref[0]
        q = qkv[:, :D] * scale                                        # fold 1/sqrt(dh) once
        k = qkv[:, D:2 * D]
        v = qkv[:, 2 * D:]

        def to_heads(t):                                              # (N, D) -> (H, N, dh)
            return jnp.concatenate(
                [t[None, :, hh * head_dim:(hh + 1) * head_dim] for hh in range(num_heads)],
                axis=0).astype(BF16)

        qh, kh, vh = to_heads(q), to_heads(k), to_heads(v)

        # batched (leading head dim) MXU dots: scores and context for all heads at once
        s = lax.dot_general(qh, kh, (((2,), (2,)), ((0,), (0,))),
                            preferred_element_type=jnp.float32)       # (H, N, N)
        s = s + mask_bias
        s = s - jnp.max(s, axis=-1, keepdims=True)                    # stable softmax, f32
        p = jnp.exp(s)
        p = p / jnp.sum(p, axis=-1, keepdims=True)
        ctx = lax.dot_general(p.astype(BF16), vh, (((2,), (1,)), ((0,), (0,))),
                              preferred_element_type=jnp.float32)     # (H, N, dh)
        ctx2d = jnp.concatenate([ctx[hh] for hh in range(num_heads)], axis=-1)  # (N, D)

        # BertSelfOutput: dense + dropout(identity) + residual + LayerNorm
        attn = jnp.dot(ctx2d.astype(BF16), wao_ref[0],
                       preferred_element_type=jnp.float32) + bao_ref[0] + x
        attn = _layernorm(attn, lnag_ref[0], lnab_ref[0])

        # BertIntermediate: dense + exact (erf) GELU
        inter = jnp.dot(attn.astype(BF16), wi_ref[0],
                        preferred_element_type=jnp.float32) + bi_ref[0]
        inter = _gelu_exact(inter)

        # BertOutput: dense + dropout(identity) + residual + LayerNorm
        out = jnp.dot(inter.astype(BF16), wo_ref[0],
                      preferred_element_type=jnp.float32) + bo_ref[0] + attn
        h_ref[0] = _layernorm(out, lnog_ref[0], lnob_ref[0])

    return kernel


# --------------------------------------------------------------------------------------
# pallas_call wrapper: one call for the whole module.
# --------------------------------------------------------------------------------------
def video_encoding_trans(video_features, video_mask, temporal_tokens, params, cfg):
    del temporal_tokens  # see TODO(synk) at top
    emb_params, stacked16, pe = params
    B, N, Df = video_features.shape
    D = cfg["hidden_size"]
    L = cfg["num_hidden_layers"]
    H = cfg["num_attention_heads"]

    # Fuse the Q/K/V weight/bias stacks once at the wrapper level: (L, D, 3D) / (L, 1, 3D)
    (Wq, bq, Wk, bk, Wv, bv, Wao, bao, lnag, lnab,
     Wi, bi, Wo, bo, lnog, lnob) = stacked16
    Wqkv = jnp.concatenate([Wq, Wk, Wv], axis=-1)
    bqkv = jnp.concatenate([bq, bk, bv], axis=-1)
    layer_params = (Wqkv, bqkv, Wao, bao, lnag, lnab, Wi, bi, Wo, bo, lnog, lnob)

    mask3 = video_mask.astype(jnp.float32)[:, None, :]                # (B, 1, N)
    kernel = make_fused_kernel(H, D // H, D)

    def const_spec(shape):                                            # same block every step
        return pl.BlockSpec(shape, lambda b, l, _n=len(shape): (0,) * _n)

    def per_layer_spec(shape):                                        # stacked (L, ...) params
        return pl.BlockSpec((1,) + tuple(shape[1:]),
                            lambda b, l, _n=len(shape): (l,) + (0,) * (_n - 1))

    in_specs = [
        pl.BlockSpec((1, N, Df), lambda b, l: (b, 0, 0)),             # video features
        pl.BlockSpec((1, 1, N), lambda b, l: (b, 0, 0)),              # key mask
        const_spec(pe.shape),
        *[const_spec(p.shape) for p in emb_params],
        *[per_layer_spec(p.shape) for p in layer_params],
    ]

    return pl.pallas_call(
        kernel,
        out_shape=jax.ShapeDtypeStruct((B, N, D), jnp.float32),
        grid=(B, L),                                                   # L innermost: h resident
        in_specs=in_specs,
        out_specs=pl.BlockSpec((1, N, D), lambda b, l: (b, 0, 0)),
        compiler_params=pltpu.CompilerParams(
            dimension_semantics=("parallel", "arbitrary"),
            vmem_limit_bytes=32 * 1024 * 1024),
    )(video_features.astype(jnp.float32), mask3, pe, *emb_params, *layer_params)


# --------------------------------------------------------------------------------------
# Parameter / position-encoding construction (deterministic, in-script)
# --------------------------------------------------------------------------------------
def build_position_encoding(n_filters, max_len):
    position = np.arange(max_len, dtype=np.float32)[:, None]
    div_term = np.exp(np.arange(0, n_filters, 2, dtype=np.float32)
                      * (-math.log(10000.0) / n_filters))
    pe = np.zeros((max_len, n_filters), dtype=np.float32)
    pe[:, 0::2] = np.sin(position * div_term)
    pe[:, 1::2] = np.cos(position * div_term)
    return jnp.asarray(pe)


def init_params(key, cfg, seq_len):
    D = cfg["hidden_size"]
    Df = cfg["video_feature_size"]
    I = cfg["intermediate_size"]
    L = cfg["num_hidden_layers"]
    keys = iter(jax.random.split(key, 4 + 12 * L))

    def dense(din, dout):
        W = jax.random.normal(next(keys), (din, dout), jnp.float32) * 0.02
        b = jax.random.normal(next(keys), (1, dout), jnp.float32) * 0.02
        return W.astype(BF16), b          # weight matrices stored bf16, biases f32

    def ln(d):
        return jnp.ones((1, d), jnp.float32), jnp.zeros((1, d), jnp.float32)

    g1, b1 = ln(Df)
    W, bW = dense(Df, D)
    g2, b2 = ln(D)
    emb_params = (g1, b1, W, bW, g2, b2)

    per_layer = []
    for _ in range(L):
        Wq, bq = dense(D, D)
        Wk, bk = dense(D, D)
        Wv, bv = dense(D, D)
        Wao, bao = dense(D, D)
        lnag, lnab = ln(D)
        Wi, bi = dense(D, I)
        Wo, bo = dense(I, D)
        lnog, lnob = ln(D)
        per_layer.append((Wq, bq, Wk, bk, Wv, bv, Wao, bao,
                          lnag, lnab, Wi, bi, Wo, bo, lnog, lnob))

    # Stack each parameter over layers: (L, ...) so a single pallas_call can stream
    # layer l's weights per grid step while the hidden state stays VMEM-resident.
    stacked = tuple(jnp.stack([lp[i] for lp in per_layer], axis=0) for i in range(16))

    pe = build_position_encoding(D, cfg["max_v_len"] * cfg["max_n_len"])[:seq_len]
    return emb_params, stacked, pe


# --------------------------------------------------------------------------------------
# Pure-JAX reference mirroring the kernel's mixed precision (bf16 matmuls, f32 elsewhere)
# --------------------------------------------------------------------------------------
def ref_forward(x, mask, params, cfg):
    emb_params, stacked, pe = params
    g1, b1, W, bW, g2, b2 = emb_params
    eps = cfg["layer_norm_eps"]
    H = cfg["num_attention_heads"]
    L = cfg["num_hidden_layers"]

    def bdot(a, w):
        return jnp.matmul(a.astype(BF16), w, preferred_element_type=jnp.float32)

    xn = _layernorm(x, g1, b1, eps)
    h = jnp.maximum(bdot(xn, W) + bW, 0.0)
    h = _layernorm(h, g2, b2, eps) + pe[None]

    B, N, D = h.shape
    dh = D // H
    scale = 1.0 / math.sqrt(dh)
    mask_bias = ((1.0 - mask) * -10000.0)[:, None, None, :]           # (B, 1, 1, N)

    for l in range(L):
        (Wq, bq, Wk, bk, Wv, bv, Wao, bao, lnag, lnab,
         Wi, bi, Wo, bo, lnog, lnob) = [p[l] for p in stacked]
        q = (bdot(h, Wq) + bq) * scale
        k = bdot(h, Wk) + bk
        v = bdot(h, Wv) + bv
        qh = q.reshape(B, N, H, dh).astype(BF16)
        kh = k.reshape(B, N, H, dh).astype(BF16)
        vh = v.reshape(B, N, H, dh).astype(BF16)
        s = jnp.einsum("bnhd,bmhd->bhnm", qh, kh,
                       preferred_element_type=jnp.float32) + mask_bias
        p_attn = jax.nn.softmax(s, axis=-1)
        ctx = jnp.einsum("bhnm,bmhd->bnhd", p_attn.astype(BF16), vh,
                         preferred_element_type=jnp.float32).reshape(B, N, D)
        attn = _layernorm(bdot(ctx, Wao) + bao + h, lnag, lnab, eps)
        inter = jax.nn.gelu(bdot(attn, Wi) + bi, approximate=False)   # exact erf GELU
        h = _layernorm(bdot(inter, Wo) + bo + attn, lnog, lnob, eps)
    return h


# --------------------------------------------------------------------------------------
if __name__ == "__main__":
    cfg = dict(
        video_feature_size=48,
        hidden_size=32,
        intermediate_size=64,
        num_attention_heads=4,
        num_hidden_layers=2,
        max_v_len=8,
        max_n_len=1,
        layer_norm_eps=LAYER_NORM_EPS,
    )
    B, N = 2, 8

    key = jax.random.PRNGKey(0)
    k_x, k_p = jax.random.split(key)

    video_features = jax.random.normal(k_x, (B, N, cfg["video_feature_size"]), jnp.float32)
    video_mask = jnp.ones((B, N), jnp.float32).at[1, 6:].set(0.0)     # pad last 2 of batch 1
    temporal_tokens = jnp.zeros((B, N), jnp.int32)

    params = init_params(k_p, cfg, N)

    out = video_encoding_trans(video_features, video_mask, temporal_tokens, params, cfg)
    out = jax.block_until_ready(out)

    ref = ref_forward(video_features, video_mask, params, cfg)
    np.testing.assert_allclose(np.asarray(out), np.asarray(ref), atol=2e-3, rtol=2e-3)

    print("KERNEL_OK")
</pallas_src>

<mosaic_0001>
module attributes {stable_mosaic.version = 11 : i64} {
  func.func @kernel(%arg0: i32, %arg1: i32, %arg2: memref<1x8x48xf32, #tpu.memory_space<vmem>>, %arg3: memref<1x1x8xf32, #tpu.memory_space<vmem>>, %arg4: memref<8x32xf32, #tpu.memory_space<vmem>>, %arg5: memref<1x48xf32, #tpu.memory_space<vmem>>, %arg6: memref<1x48xf32, #tpu.memory_space<vmem>>, %arg7: memref<48x32xbf16, #tpu.memory_space<vmem>>, %arg8: memref<1x32xf32, #tpu.memory_space<vmem>>, %arg9: memref<1x32xf32, #tpu.memory_space<vmem>>, %arg10: memref<1x32xf32, #tpu.memory_space<vmem>>, %arg11: memref<1x32x96xbf16, #tpu.memory_space<vmem>>, %arg12: memref<1x1x96xf32, #tpu.memory_space<vmem>>, %arg13: memref<1x32x32xbf16, #tpu.memory_space<vmem>>, %arg14: memref<1x1x32xf32, #tpu.memory_space<vmem>>, %arg15: memref<1x1x32xf32, #tpu.memory_space<vmem>>, %arg16: memref<1x1x32xf32, #tpu.memory_space<vmem>>, %arg17: memref<1x32x64xbf16, #tpu.memory_space<vmem>>, %arg18: memref<1x1x64xf32, #tpu.memory_space<vmem>>, %arg19: memref<1x64x32xbf16, #tpu.memory_space<vmem>>, %arg20: memref<1x1x32xf32, #tpu.memory_space<vmem>>, %arg21: memref<1x1x32xf32, #tpu.memory_space<vmem>>, %arg22: memref<1x1x32xf32, #tpu.memory_space<vmem>>, %arg23: memref<1x8x32xf32, #tpu.memory_space<vmem>>) attributes {dimension_semantics = [#tpu.dimension_semantics<parallel>, #tpu.dimension_semantics<arbitrary>], iteration_bounds = array<i64: 2, 2>, scalar_prefetch = 0 : i64, scratch_operands = 0 : i64, tpu.core_type = #tpu.core_type<tc>, window_params = [{transform_indices = @transform_0, window_bounds = array<i64: 1, 8, 48>}, {transform_indices = @transform_1, window_bounds = array<i64: 1, 1, 8>}, {pipeline_mode = #tpu.pipeline_mode<synchronous>, transform_indices = @transform_2, window_bounds = array<i64: 8, 32>}, {pipeline_mode = #tpu.pipeline_mode<synchronous>, transform_indices = @transform_3, window_bounds = array<i64: 1, 48>}, {pipeline_mode = #tpu.pipeline_mode<synchronous>, transform_indices = @transform_4, window_bounds = array<i64: 1, 48>}, {pipeline_mode = #tpu.pipeline_mode<synchronous>, transform_indices = @transform_5, window_bounds = array<i64: 48, 32>}, {pipeline_mode = #tpu.pipeline_mode<synchronous>, transform_indices = @transform_6, window_bounds = array<i64: 1, 32>}, {pipeline_mode = #tpu.pipeline_mode<synchronous>, transform_indices = @transform_7, window_bounds = array<i64: 1, 32>}, {pipeline_mode = #tpu.pipeline_mode<synchronous>, transform_indices = @transform_8, window_bounds = array<i64: 1, 32>}, {transform_indices = @transform_9, window_bounds = array<i64: 1, 32, 96>}, {transform_indices = @transform_10, window_bounds = array<i64: 1, 1, 96>}, {transform_indices = @transform_11, window_bounds = array<i64: 1, 32, 32>}, {transform_indices = @transform_12, window_bounds = array<i64: 1, 1, 32>}, {transform_indices = @transform_13, window_bounds = array<i64: 1, 1, 32>}, {transform_indices = @transform_14, window_bounds = array<i64: 1, 1, 32>}, {transform_indices = @transform_15, window_bounds = array<i64: 1, 32, 64>}, {transform_indices = @transform_16, window_bounds = array<i64: 1, 1, 64>}, {transform_indices = @transform_17, window_bounds = array<i64: 1, 64, 32>}, {transform_indices = @transform_18, window_bounds = array<i64: 1, 1, 32>}, {transform_indices = @transform_19, window_bounds = array<i64: 1, 1, 32>}, {transform_indices = @transform_20, window_bounds = array<i64: 1, 1, 32>}, {transform_indices = @transform_21, window_bounds = array<i64: 1, 8, 32>}]} {
    %c0_i32 = arith.constant 0 : i32
    %0 = arith.cmpi eq, %arg1, %c0_i32 : i32
    %1 = arith.extui %0 : i1 to i32
    %c0_i32_0 = arith.constant 0 : i32
    %2 = arith.cmpi ne, %1, %c0_i32_0 : i32
    scf.if %2 {
      %c0_80 = arith.constant 0 : index
      %c0_81 = arith.constant 0 : index
      %c0_82 = arith.constant 0 : index
      %199 = vector.load %arg2[%c0_80, %c0_81, %c0_82] : memref<1x8x48xf32, #tpu.memory_space<vmem>>, vector<1x8x48xf32>
      %200 = vector.shape_cast %199 : vector<1x8x48xf32> to vector<8x48xf32>
      %c0_83 = arith.constant 0 : index
      %c0_84 = arith.constant 0 : index
      %201 = vector.load %arg5[%c0_83, %c0_84] : memref<1x48xf32, #tpu.memory_space<vmem>>, vector<1x48xf32>
      %c0_85 = arith.constant 0 : index
      %c0_86 = arith.constant 0 : index
      %202 = vector.load %arg6[%c0_85, %c0_86] : memref<1x48xf32, #tpu.memory_space<vmem>>, vector<1x48xf32>
      %cst_87 = arith.constant dense<0.000000e+00> : vector<8xf32>
      %203 = vector.multi_reduction <add>, %200, %cst_87 [1] : vector<8x48xf32> to vector<8xf32>
      %204 = vector.shape_cast %203 : vector<8xf32> to vector<8x1xf32>
      %cst_88 = arith.constant 4.800000e+01 : f32
      %205 = vector.broadcast %cst_88 : f32 to vector<8x1xf32>
      %206 = arith.divf %204, %205 : vector<8x1xf32>
      %207 = vector.broadcast %206 : vector<8x1xf32> to vector<8x48xf32>
      %208 = arith.subf %200, %207 : vector<8x48xf32>
      %209 = arith.mulf %208, %208 : vector<8x48xf32>
      %cst_89 = arith.constant dense<0.000000e+00> : vector<8xf32>
      %210 = vector.multi_reduction <add>, %209, %cst_89 [1] : vector<8x48xf32> to vector<8xf32>
      %211 = vector.shape_cast %210 : vector<8xf32> to vector<8x1xf32>
      %cst_90 = arith.constant 4.800000e+01 : f32
      %212 = vector.broadcast %cst_90 : f32 to vector<8x1xf32>
      %213 = arith.divf %211, %212 : vector<8x1xf32>
      %214 = vector.broadcast %206 : vector<8x1xf32> to vector<8x48xf32>
      %215 = arith.subf %200, %214 : vector<8x48xf32>
      %cst_91 = arith.constant 9.99999996E-13 : f32
      %216 = vector.broadcast %cst_91 : f32 to vector<8x1xf32>
      %217 = arith.addf %213, %216 : vector<8x1xf32>
      %218 = math.rsqrt %217 : vector<8x1xf32>
      %219 = vector.broadcast %218 : vector<8x1xf32> to vector<8x48xf32>
      %220 = arith.mulf %215, %219 : vector<8x48xf32>
      %221 = vector.broadcast %201 : vector<1x48xf32> to vector<8x48xf32>
      %222 = arith.mulf %220, %221 : vector<8x48xf32>
      %223 = vector.broadcast %202 : vector<1x48xf32> to vector<8x48xf32>
      %224 = arith.addf %222, %223 : vector<8x48xf32>
      %225 = arith.truncf %224 : vector<8x48xf32> to vector<8x48xbf16>
      %c0_92 = arith.constant 0 : index
      %c0_93 = arith.constant 0 : index
      %226 = vector.load %arg7[%c0_92, %c0_93] : memref<48x32xbf16, #tpu.memory_space<vmem>>, vector<48x32xbf16>
      %cst_94 = arith.constant dense<0.000000e+00> : vector<8x32xf32>
      %227 = tpu.matmul %225, %226, %cst_94 {dimension_numbers = #tpu.dot_dimension_numbers<[1], [0], [0], [1], [0, 0, 1, 1], [], []>} : vector<8x48xbf16>, vector<48x32xbf16>, vector<8x32xf32> -> vector<8x32xf32>
      %c0_95 = arith.constant 0 : index
      %c0_96 = arith.constant 0 : index
      %228 = vector.load %arg8[%c0_95, %c0_96] : memref<1x32xf32, #tpu.memory_space<vmem>>, vector<1x32xf32>
      %229 = vector.broadcast %228 : vector<1x32xf32> to vector<8x32xf32>
      %230 = arith.addf %227, %229 : vector<8x32xf32>
      %cst_97 = arith.constant 0.000000e+00 : f32
      %231 = vector.broadcast %cst_97 : f32 to vector<8x32xf32>
      %232 = arith.maximumf %230, %231 : vector<8x32xf32>
      %c0_98 = arith.constant 0 : index
      %c0_99 = arith.constant 0 : index
      %233 = vector.load %arg9[%c0_98, %c0_99] : memref<1x32xf32, #tpu.memory_space<vmem>>, vector<1x32xf32>
      %c0_100 = arith.constant 0 : index
      %c0_101 = arith.constant 0 : index
      %234 = vector.load %arg10[%c0_100, %c0_101] : memref<1x32xf32, #tpu.memory_space<vmem>>, vector<1x32xf32>
      %cst_102 = arith.constant dense<0.000000e+00> : vector<8xf32>
      %235 = vector.multi_reduction <add>, %232, %cst_102 [1] : vector<8x32xf32> to vector<8xf32>
      %236 = vector.shape_cast %235 : vector<8xf32> to vector<8x1xf32>
      %cst_103 = arith.constant 3.200000e+01 : f32
      %237 = vector.broadcast %cst_103 : f32 to vector<8x1xf32>
      %238 = arith.divf %236, %237 : vector<8x1xf32>
      %239 = vector.broadcast %238 : vector<8x1xf32> to vector<8x32xf32>
      %240 = arith.subf %232, %239 : vector<8x32xf32>
      %241 = arith.mulf %240, %240 : vector<8x32xf32>
      %cst_104 = arith.constant dense<0.000000e+00> : vector<8xf32>
      %242 = vector.multi_reduction <add>, %241, %cst_104 [1] : vector<8x32xf32> to vector<8xf32>
      %243 = vector.shape_cast %242 : vector<8xf32> to vector<8x1xf32>
      %cst_105 = arith.constant 3.200000e+01 : f32
      %244 = vector.broadcast %cst_105 : f32 to vector<8x1xf32>
      %245 = arith.divf %243, %244 : vector<8x1xf32>
      %246 = vector.broadcast %238 : vector<8x1xf32> to vector<8x32xf32>
      %247 = arith.subf %232, %246 : vector<8x32xf32>
      %cst_106 = arith.constant 9.99999996E-13 : f32
      %248 = vector.broadcast %cst_106 : f32 to vector<8x1xf32>
      %249 = arith.addf %245, %248 : vector<8x1xf32>
      %250 = math.rsqrt %249 : vector<8x1xf32>
      %251 = vector.broadcast %250 : vector<8x1xf32> to vector<8x32xf32>
      %252 = arith.mulf %247, %251 : vector<8x32xf32>
      %253 = vector.broadcast %233 : vector<1x32xf32> to vector<8x32xf32>
      %254 = arith.mulf %252, %253 : vector<8x32xf32>
      %255 = vector.broadcast %234 : vector<1x32xf32> to vector<8x32xf32>
      %256 = arith.addf %254, %255 : vector<8x32xf32>
      %c0_107 = arith.constant 0 : index
      %c0_108 = arith.constant 0 : index
      %257 = vector.load %arg4[%c0_107, %c0_108] : memref<8x32xf32, #tpu.memory_space<vmem>>, vector<8x32xf32>
      %258 = arith.addf %256, %257 : vector<8x32xf32>
      %c0_109 = arith.constant 0 : index
      %c0_110 = arith.constant 0 : index
      %c0_111 = arith.constant 0 : index
      %259 = vector.load %arg23[%c0_109, %c0_110, %c0_111] : memref<1x8x32xf32, #tpu.memory_space<vmem>>, vector<1x8x32xf32>
      %260 = vector.shape_cast %259 : vector<1x8x32xf32> to vector<8x32xf32>
      %261 = vector.shape_cast %258 : vector<8x32xf32> to vector<1x8x32xf32>
      tpu.vector_store %arg23[%c0_109, %c0_110, %c0_111], %261 {strides = array<i32>} : memref<1x8x32xf32, #tpu.memory_space<vmem>>, vector<1x8x32xf32>,
    } else {
    }
    %c0 = arith.constant 0 : index
    %c0_1 = arith.constant 0 : index
    %c0_2 = arith.constant 0 : index
    %3 = vector.load %arg23[%c0, %c0_1, %c0_2] : memref<1x8x32xf32, #tpu.memory_space<vmem>>, vector<1x8x32xf32>
    %4 = vector.shape_cast %3 : vector<1x8x32xf32> to vector<8x32xf32>
    %5 = arith.truncf %4 : vector<8x32xf32> to vector<8x32xbf16>
    %c0_3 = arith.constant 0 : index
    %c0_4 = arith.constant 0 : index
    %c0_5 = arith.constant 0 : index
    %6 = vector.load %arg3[%c0_3, %c0_4, %c0_5] : memref<1x1x8xf32, #tpu.memory_space<vmem>>, vector<1x1x8xf32>
    %7 = vector.shape_cast %6 : vector<1x1x8xf32> to vector<1x8xf32>
    %cst = arith.constant 1.000000e+00 : f32
    %8 = vector.broadcast %cst : f32 to vector<1x8xf32>
    %9 = arith.subf %8, %7 : vector<1x8xf32>
    %cst_6 = arith.constant -1.000000e+04 : f32
    %10 = vector.broadcast %cst_6 : f32 to vector<1x8xf32>
    %11 = arith.mulf %9, %10 : vector<1x8xf32>
    %c0_7 = arith.constant 0 : index
    %c0_8 = arith.constant 0 : index
    %c0_9 = arith.constant 0 : index
    %12 = vector.load %arg11[%c0_7, %c0_8, %c0_9] : memref<1x32x96xbf16, #tpu.memory_space<vmem>>, vector<1x32x96xbf16>
    %13 = vector.shape_cast %12 : vector<1x32x96xbf16> to vector<32x96xbf16>
    %cst_10 = arith.constant dense<0.000000e+00> : vector<8x96xf32>
    %14 = tpu.matmul %5, %13, %cst_10 {dimension_numbers = #tpu.dot_dimension_numbers<[1], [0], [0], [1], [0, 0, 1, 1], [], []>} : vector<8x32xbf16>, vector<32x96xbf16>, vector<8x96xf32> -> vector<8x96xf32>
    %c0_11 = arith.constant 0 : index
    %c0_12 = arith.constant 0 : index
    %c0_13 = arith.constant 0 : index
    %15 = vector.load %arg12[%c0_11, %c0_12, %c0_13] : memref<1x1x96xf32, #tpu.memory_space<vmem>>, vector<1x1x96xf32>
    %16 = vector.shape_cast %15 : vector<1x1x96xf32> to vector<1x96xf32>
    %17 = vector.broadcast %16 : vector<1x96xf32> to vector<8x96xf32>
    %18 = arith.addf %14, %17 : vector<8x96xf32>
    %19 = vector.extract_strided_slice %18 {offsets = [0, 0], sizes = [8, 32], strides = [1, 1]} : vector<8x96xf32> to vector<8x32xf32>
    %cst_14 = arith.constant 0.353553385 : f32
    %20 = vector.broadcast %cst_14 : f32 to vector<8x32xf32>
    %21 = arith.mulf %19, %20 : vector<8x32xf32>
    %22 = vector.extract_strided_slice %18 {offsets = [0, 32], sizes = [8, 32], strides = [1, 1]} : vector<8x96xf32> to vector<8x32xf32>
    %23 = vector.extract_strided_slice %18 {offsets = [0, 64], sizes = [8, 32], strides = [1, 1]} : vector<8x96xf32> to vector<8x32xf32>
    %24 = vector.extract_strided_slice %21 {offsets = [0, 0], sizes = [8, 8], strides = [1, 1]} : vector<8x32xf32> to vector<8x8xf32>
    %25 = vector.shape_cast %24 : vector<8x8xf32> to vector<1x8x8xf32>
    %26 = vector.extract_strided_slice %21 {offsets = [0, 8], sizes = [8, 8], strides = [1, 1]} : vector<8x32xf32> to vector<8x8xf32>
    %27 = vector.shape_cast %26 : vector<8x8xf32> to vector<1x8x8xf32>
    %28 = vector.extract_strided_slice %21 {offsets = [0, 16], sizes = [8, 8], strides = [1, 1]} : vector<8x32xf32> to vector<8x8xf32>
    %29 = vector.shape_cast %28 : vector<8x8xf32> to vector<1x8x8xf32>
    %30 = vector.extract_strided_slice %21 {offsets = [0, 24], sizes = [8, 8], strides = [1, 1]} : vector<8x32xf32> to vector<8x8xf32>
    %31 = vector.shape_cast %30 : vector<8x8xf32> to vector<1x8x8xf32>
    %32 = tpu.concatenate %25, %27, %29, %31 in 0 : vector<1x8x8xf32>, vector<1x8x8xf32>, vector<1x8x8xf32>, vector<1x8x8xf32> -> vector<4x8x8xf32>
    %33 = arith.truncf %32 : vector<4x8x8xf32> to vector<4x8x8xbf16>
    %34 = vector.extract_strided_slice %22 {offsets = [0, 0], sizes = [8, 8], strides = [1, 1]} : vector<8x32xf32> to vector<8x8xf32>
    %35 = vector.shape_cast %34 : vector<8x8xf32> to vector<1x8x8xf32>
    %36 = vector.extract_strided_slice %22 {offsets = [0, 8], sizes = [8, 8], strides = [1, 1]} : vector<8x32xf32> to vector<8x8xf32>
    %37 = vector.shape_cast %36 : vector<8x8xf32> to vector<1x8x8xf32>
    %38 = vector.extract_strided_slice %22 {offsets = [0, 16], sizes = [8, 8], strides = [1, 1]} : vector<8x32xf32> to vector<8x8xf32>
    %39 = vector.shape_cast %38 : vector<8x8xf32> to vector<1x8x8xf32>
    %40 = vector.extract_strided_slice %22 {offsets = [0, 24], sizes = [8, 8], strides = [1, 1]} : vector<8x32xf32> to vector<8x8xf32>
    %41 = vector.shape_cast %40 : vector<8x8xf32> to vector<1x8x8xf32>
    %42 = tpu.concatenate %35, %37, %39, %41 in 0 : vector<1x8x8xf32>, vector<1x8x8xf32>, vector<1x8x8xf32>, vector<1x8x8xf32> -> vector<4x8x8xf32>
    %43 = arith.truncf %42 : vector<4x8x8xf32> to vector<4x8x8xbf16>
    %44 = vector.extract_strided_slice %23 {offsets = [0, 0], sizes = [8, 8], strides = [1, 1]} : vector<8x32xf32> to vector<8x8xf32>
    %45 = vector.shape_cast %44 : vector<8x8xf32> to vector<1x8x8xf32>
    %46 = vector.extract_strided_slice %23 {offsets = [0, 8], sizes = [8, 8], strides = [1, 1]} : vector<8x32xf32> to vector<8x8xf32>
    %47 = vector.shape_cast %46 : vector<8x8xf32> to vector<1x8x8xf32>
    %48 = vector.extract_strided_slice %23 {offsets = [0, 16], sizes = [8, 8], strides = [1, 1]} : vector<8x32xf32> to vector<8x8xf32>
    %49 = vector.shape_cast %48 : vector<8x8xf32> to vector<1x8x8xf32>
    %50 = vector.extract_strided_slice %23 {offsets = [0, 24], sizes = [8, 8], strides = [1, 1]} : vector<8x32xf32> to vector<8x8xf32>
    %51 = vector.shape_cast %50 : vector<8x8xf32> to vector<1x8x8xf32>
    %52 = tpu.concatenate %45, %47, %49, %51 in 0 : vector<1x8x8xf32>, vector<1x8x8xf32>, vector<1x8x8xf32>, vector<1x8x8xf32> -> vector<4x8x8xf32>
    %53 = arith.truncf %52 : vector<4x8x8xf32> to vector<4x8x8xbf16>
    %cst_15 = arith.constant dense<0.000000e+00> : vector<4x8x8xf32>
    %54 = tpu.matmul %33, %43, %cst_15 {dimension_numbers = #tpu.dot_dimension_numbers<[2], [2], [1], [1], [0, 0, 0, 1, 1, 1], [0], [0]>} : vector<4x8x8xbf16>, vector<4x8x8xbf16>, vector<4x8x8xf32> -> vector<4x8x8xf32>
    %55 = vector.shape_cast %11 : vector<1x8xf32> to vector<1x1x8xf32>
    %56 = vector.broadcast %55 : vector<1x1x8xf32> to vector<4x8x8xf32>
    %57 = arith.addf %54, %56 : vector<4x8x8xf32>
    %cst_16 = arith.constant dense<0xFF800000> : vector<4x8xf32>
    %58 = vector.multi_reduction <maximumf>, %57, %cst_16 [2] : vector<4x8x8xf32> to vector<4x8xf32>
    %59 = vector.shape_cast %58 : vector<4x8xf32> to vector<4x8x1xf32>
    %60 = vector.broadcast %59 : vector<4x8x1xf32> to vector<4x8x8xf32>
    %61 = arith.subf %57, %60 : vector<4x8x8xf32>
    %62 = math.exp %61 : vector<4x8x8xf32>
    %cst_17 = arith.constant dense<0.000000e+00> : vector<4x8xf32>
    %63 = vector.multi_reduction <add>, %62, %cst_17 [2] : vector<4x8x8xf32> to vector<4x8xf32>
    %64 = vector.shape_cast %63 : vector<4x8xf32> to vector<4x8x1xf32>
    %65 = vector.broadcast %64 : vector<4x8x1xf32> to vector<4x8x8xf32>
    %66 = arith.divf %62, %65 : vector<4x8x8xf32>
    %67 = arith.truncf %66 : vector<4x8x8xf32> to vector<4x8x8xbf16>
    %cst_18 = arith.constant dense<0.000000e+00> : vector<4x8x8xf32>
    %68 = tpu.matmul %67, %53, %cst_18 {dimension_numbers = #tpu.dot_dimension_numbers<[2], [1], [1], [2], [0, 0, 0, 1, 1, 2], [0], [0]>} : vector<4x8x8xbf16>, vector<4x8x8xbf16>, vector<4x8x8xf32> -> vector<4x8x8xf32>
    %69 = vector.extract_strided_slice %68 {offsets = [0, 0, 0], sizes = [1, 8, 8], strides = [1, 1, 1]} : vector<4x8x8xf32> to vector<1x8x8xf32>
    %70 = vector.shape_cast %69 : vector<1x8x8xf32> to vector<8x8xf32>
    %71 = vector.extract_strided_slice %68 {offsets = [1, 0, 0], sizes = [1, 8, 8], strides = [1, 1, 1]} : vector<4x8x8xf32> to vector<1x8x8xf32>
    %72 = vector.shape_cast %71 : vector<1x8x8xf32> to vector<8x8xf32>
    %73 = vector.extract_strided_slice %68 {offsets = [2, 0, 0], sizes = [1, 8, 8], strides = [1, 1, 1]} : vector<4x8x8xf32> to vector<1x8x8xf32>
    %74 = vector.shape_cast %73 : vector<1x8x8xf32> to vector<8x8xf32>
    %75 = vector.extract_strided_slice %68 {offsets = [3, 0, 0], sizes = [1, 8, 8], strides = [1, 1, 1]} : vector<4x8x8xf32> to vector<1x8x8xf32>
    %76 = vector.shape_cast %75 : vector<1x8x8xf32> to vector<8x8xf32>
    %77 = tpu.concatenate %70, %72, %74, %76 in 1 : vector<8x8xf32>, vector<8x8xf32>, vector<8x8xf32>, vector<8x8xf32> -> vector<8x32xf32>
    %78 = arith.truncf %77 : vector<8x32xf32> to vector<8x32xbf16>
    %c0_19 = arith.constant 0 : index
    %c0_20 = arith.constant 0 : index
    %c0_21 = arith.constant 0 : index
    %79 = vector.load %arg13[%c0_19, %c0_20, %c0_21] : memref<1x32x32xbf16, #tpu.memory_space<vmem>>, vector<1x32x32xbf16>
    %80 = vector.shape_cast %79 : vector<1x32x32xbf16> to vector<32x32xbf16>
    %cst_22 = arith.constant dense<0.000000e+00> : vector<8x32xf32>
    %81 = tpu.matmul %78, %80, %cst_22 {dimension_numbers = #tpu.dot_dimension_numbers<[1], [0], [0], [1], [0, 0, 1, 1], [], []>} : vector<8x32xbf16>, vector<32x32xbf16>, vector<8x32xf32> -> vector<8x32xf32>
    %c0_23 = arith.constant 0 : index
    %c0_24 = arith.constant 0 : index
    %c0_25 = arith.constant 0 : index
    %82 = vector.load %arg14[%c0_23, %c0_24, %c0_25] : memref<1x1x32xf32, #tpu.memory_space<vmem>>, vector<1x1x32xf32>
    %83 = vector.shape_cast %82 : vector<1x1x32xf32> to vector<1x32xf32>
    %84 = vector.broadcast %83 : vector<1x32xf32> to vector<8x32xf32>
    %85 = arith.addf %81, %84 : vector<8x32xf32>
    %86 = arith.addf %85, %4 : vector<8x32xf32>
    %c0_26 = arith.constant 0 : index
    %c0_27 = arith.constant 0 : index
    %c0_28 = arith.constant 0 : index
    %87 = vector.load %arg15[%c0_26, %c0_27, %c0_28] : memref<1x1x32xf32, #tpu.memory_space<vmem>>, vector<1x1x32xf32>
    %88 = vector.shape_cast %87 : vector<1x1x32xf32> to vector<1x32xf32>
    %c0_29 = arith.constant 0 : index
    %c0_30 = arith.constant 0 : index
    %c0_31 = arith.constant 0 : index
    %89 = vector.load %arg16[%c0_29, %c0_30, %c0_31] : memref<1x1x32xf32, #tpu.memory_space<vmem>>, vector<1x1x32xf32>
    %90 = vector.shape_cast %89 : vector<1x1x32xf32> to vector<1x32xf32>
    %cst_32 = arith.constant dense<0.000000e+00> : vector<8xf32>
    %91 = vector.multi_reduction <add>, %86, %cst_32 [1] : vector<8x32xf32> to vector<8xf32>
    %92 = vector.shape_cast %91 : vector<8xf32> to vector<8x1xf32>
    %cst_33 = arith.constant 3.200000e+01 : f32
    %93 = vector.broadcast %cst_33 : f32 to vector<8x1xf32>
    %94 = arith.divf %92, %93 : vector<8x1xf32>
    %95 = vector.broadcast %94 : vector<8x1xf32> to vector<8x32xf32>
    %96 = arith.subf %86, %95 : vector<8x32xf32>
    %97 = arith.mulf %96, %96 : vector<8x32xf32>
    %cst_34 = arith.constant dense<0.000000e+00> : vector<8xf32>
    %98 = vector.multi_reduction <add>, %97, %cst_34 [1] : vector<8x32xf32> to vector<8xf32>
    %99 = vector.shape_cast %98 : vector<8xf32> to vector<8x1xf32>
    %cst_35 = arith.constant 3.200000e+01 : f32
    %100 = vector.broadcast %cst_35 : f32 to vector<8x1xf32>
    %101 = arith.divf %99, %100 : vector<8x1xf32>
    %102 = vector.broadcast %94 : vector<8x1xf32> to vector<8x32xf32>
    %103 = arith.subf %86, %102 : vector<8x32xf32>
    %cst_36 = arith.constant 9.99999996E-13 : f32
    %104 = vector.broadcast %cst_36 : f32 to vector<8x1xf32>
    %105 = arith.addf %101, %104 : vector<8x1xf32>
    %106 = math.rsqrt %105 : vector<8x1xf32>
    %107 = vector.broadcast %106 : vector<8x1xf32> to vector<8x32xf32>
    %108 = arith.mulf %103, %107 : vector<8x32xf32>
    %109 = vector.broadcast %88 : vector<1x32xf32> to vector<8x32xf32>
    %110 = arith.mulf %108, %109 : vector<8x32xf32>
    %111 = vector.broadcast %90 : vector<1x32xf32> to vector<8x32xf32>
    %112 = arith.addf %110, %111 : vector<8x32xf32>
    %113 = arith.truncf %112 : vector<8x32xf32> to vector<8x32xbf16>
    %c0_37 = arith.constant 0 : index
    %c0_38 = arith.constant 0 : index
    %c0_39 = arith.constant 0 : index
    %114 = vector.load %arg17[%c0_37, %c0_38, %c0_39] : memref<1x32x64xbf16, #tpu.memory_space<vmem>>, vector<1x32x64xbf16>
    %115 = vector.shape_cast %114 : vector<1x32x64xbf16> to vector<32x64xbf16>
    %cst_40 = arith.constant dense<0.000000e+00> : vector<8x64xf32>
    %116 = tpu.matmul %113, %115, %cst_40 {dimension_numbers = #tpu.dot_dimension_numbers<[1], [0], [0], [1], [0, 0, 1, 1], [], []>} : vector<8x32xbf16>, vector<32x64xbf16>, vector<8x64xf32> -> vector<8x64xf32>
    %c0_41 = arith.constant 0 : index
    %c0_42 = arith.constant 0 : index
    %c0_43 = arith.constant 0 : index
    %117 = vector.load %arg18[%c0_41, %c0_42, %c0_43] : memref<1x1x64xf32, #tpu.memory_space<vmem>>, vector<1x1x64xf32>
    %118 = vector.shape_cast %117 : vector<1x1x64xf32> to vector<1x64xf32>
    %119 = vector.broadcast %118 : vector<1x64xf32> to vector<8x64xf32>
    %120 = arith.addf %116, %119 : vector<8x64xf32>
    %cst_44 = arith.constant 5.000000e-01 : f32
    %121 = vector.broadcast %cst_44 : f32 to vector<8x64xf32>
    %122 = arith.mulf %121, %120 : vector<8x64xf32>
    %cst_45 = arith.constant 0.707106769 : f32
    %123 = vector.broadcast %cst_45 : f32 to vector<8x64xf32>
    %124 = arith.mulf %120, %123 : vector<8x64xf32>
    %125 = math.absf %124 : vector<8x64xf32>
    %cst_46 = arith.constant 0.327591091 : f32
    %126 = vector.broadcast %cst_46 : f32 to vector<8x64xf32>
    %127 = arith.mulf %126, %125 : vector<8x64xf32>
    %cst_47 = arith.constant 1.000000e+00 : f32
    %128 = vector.broadcast %cst_47 : f32 to vector<8x64xf32>
    %129 = arith.addf %128, %127 : vector<8x64xf32>
    %cst_48 = arith.constant 1.000000e+00 : f32
    %130 = vector.broadcast %cst_48 : f32 to vector<8x64xf32>
    %131 = arith.divf %130, %129 : vector<8x64xf32>
    %cst_49 = arith.constant 1.06140542 : f32
    %132 = vector.broadcast %cst_49 : f32 to vector<8x64xf32>
    %133 = arith.mulf %131, %132 : vector<8x64xf32>
    %cst_50 = arith.constant -1.45315206 : f32
    %134 = vector.broadcast %cst_50 : f32 to vector<8x64xf32>
    %135 = arith.addf %134, %133 : vector<8x64xf32>
    %136 = arith.mulf %131, %135 : vector<8x64xf32>
    %cst_51 = arith.constant 1.42141378 : f32
    %137 = vector.broadcast %cst_51 : f32 to vector<8x64xf32>
    %138 = arith.addf %137, %136 : vector<8x64xf32>
    %139 = arith.mulf %131, %138 : vector<8x64xf32>
    %cst_52 = arith.constant -0.284496725 : f32
    %140 = vector.broadcast %cst_52 : f32 to vector<8x64xf32>
    %141 = arith.addf %140, %139 : vector<8x64xf32>
    %142 = arith.mulf %131, %141 : vector<8x64xf32>
    %cst_53 = arith.constant 0.254829586 : f32
    %143 = vector.broadcast %cst_53 : f32 to vector<8x64xf32>
    %144 = arith.addf %143, %142 : vector<8x64xf32>
    %145 = arith.mulf %131, %144 : vector<8x64xf32>
    %cst_54 = arith.constant 0.000000e+00 : f32
    %146 = vector.broadcast %cst_54 : f32 to vector<8x64xf32>
    %147 = arith.subf %146, %125 : vector<8x64xf32>
    %148 = arith.mulf %147, %125 : vector<8x64xf32>
    %149 = math.exp %148 : vector<8x64xf32>
    %150 = arith.mulf %145, %149 : vector<8x64xf32>
    %cst_55 = arith.constant 1.000000e+00 : f32
    %151 = vector.broadcast %cst_55 : f32 to vector<8x64xf32>
    %152 = arith.subf %151, %150 : vector<8x64xf32>
    %cst_56 = arith.constant 0.000000e+00 : f32
    %153 = vector.broadcast %cst_56 : f32 to vector<8x64xf32>
    %154 = arith.cmpf oge, %124, %153 : vector<8x64xf32>
    %cst_57 = arith.constant 0.000000e+00 : f32
    %155 = vector.broadcast %cst_57 : f32 to vector<8x64xf32>
    %156 = arith.subf %155, %152 : vector<8x64xf32>
    %157 = arith.select %154, %152, %156 : vector<8x64xi1>, vector<8x64xf32>
    %cst_58 = arith.constant 1.000000e+00 : f32
    %158 = vector.broadcast %cst_58 : f32 to vector<8x64xf32>
    %159 = arith.addf %158, %157 : vector<8x64xf32>
    %160 = arith.mulf %122, %159 : vector<8x64xf32>
    %161 = arith.truncf %160 : vector<8x64xf32> to vector<8x64xbf16>
    %c0_59 = arith.constant 0 : index
    %c0_60 = arith.constant 0 : index
    %c0_61 = arith.constant 0 : index
    %162 = vector.load %arg19[%c0_59, %c0_60, %c0_61] : memref<1x64x32xbf16, #tpu.memory_space<vmem>>, vector<1x64x32xbf16>
    %163 = vector.shape_cast %162 : vector<1x64x32xbf16> to vector<64x32xbf16>
    %cst_62 = arith.constant dense<0.000000e+00> : vector<8x32xf32>
    %164 = tpu.matmul %161, %163, %cst_62 {dimension_numbers = #tpu.dot_dimension_numbers<[1], [0], [0], [1], [0, 0, 1, 1], [], []>} : vector<8x64xbf16>, vector<64x32xbf16>, vector<8x32xf32> -> vector<8x32xf32>
    %c0_63 = arith.constant 0 : index
    %c0_64 = arith.constant 0 : index
    %c0_65 = arith.constant 0 : index
    %165 = vector.load %arg20[%c0_63, %c0_64, %c0_65] : memref<1x1x32xf32, #tpu.memory_space<vmem>>, vector<1x1x32xf32>
    %166 = vector.shape_cast %165 : vector<1x1x32xf32> to vector<1x32xf32>
    %167 = vector.broadcast %166 : vector<1x32xf32> to vector<8x32xf32>
    %168 = arith.addf %164, %167 : vector<8x32xf32>
    %169 = arith.addf %168, %112 : vector<8x32xf32>
    %c0_66 = arith.constant 0 : index
    %c0_67 = arith.constant 0 : index
    %c0_68 = arith.constant 0 : index
    %170 = vector.load %arg21[%c0_66, %c0_67, %c0_68] : memref<1x1x32xf32, #tpu.memory_space<vmem>>, vector<1x1x32xf32>
    %171 = vector.shape_cast %170 : vector<1x1x32xf32> to vector<1x32xf32>
    %c0_69 = arith.constant 0 : index
    %c0_70 = arith.constant 0 : index
    %c0_71 = arith.constant 0 : index
    %172 = vector.load %arg22[%c0_69, %c0_70, %c0_71] : memref<1x1x32xf32, #tpu.memory_space<vmem>>, vector<1x1x32xf32>
    %173 = vector.shape_cast %172 : vector<1x1x32xf32> to vector<1x32xf32>
    %cst_72 = arith.constant dense<0.000000e+00> : vector<8xf32>
    %174 = vector.multi_reduction <add>, %169, %cst_72 [1] : vector<8x32xf32> to vector<8xf32>
    %175 = vector.shape_cast %174 : vector<8xf32> to vector<8x1xf32>
    %cst_73 = arith.constant 3.200000e+01 : f32
    %176 = vector.broadcast %cst_73 : f32 to vector<8x1xf32>
    %177 = arith.divf %175, %176 : vector<8x1xf32>
    %178 = vector.broadcast %177 : vector<8x1xf32> to vector<8x32xf32>
    %179 = arith.subf %169, %178 : vector<8x32xf32>
    %180 = arith.mulf %179, %179 : vector<8x32xf32>
    %cst_74 = arith.constant dense<0.000000e+00> : vector<8xf32>
    %181 = vector.multi_reduction <add>, %180, %cst_74 [1] : vector<8x32xf32> to vector<8xf32>
    %182 = vector.shape_cast %181 : vector<8xf32> to vector<8x1xf32>
    %cst_75 = arith.constant 3.200000e+01 : f32
    %183 = vector.broadcast %cst_75 : f32 to vector<8x1xf32>
    %184 = arith.divf %182, %183 : vector<8x1xf32>
    %185 = vector.broadcast %177 : vector<8x1xf32> to vector<8x32xf32>
    %186 = arith.subf %169, %185 : vector<8x32xf32>
    %cst_76 = arith.constant 9.99999996E-13 : f32
    %187 = vector.broadcast %cst_76 : f32 to vector<8x1xf32>
    %188 = arith.addf %184, %187 : vector<8x1xf32>
    %189 = math.rsqrt %188 : vector<8x1xf32>
    %190 = vector.broadcast %189 : vector<8x1xf32> to vector<8x32xf32>
    %191 = arith.mulf %186, %190 : vector<8x32xf32>
    %192 = vector.broadcast %171 : vector<1x32xf32> to vector<8x32xf32>
    %193 = arith.mulf %191, %192 : vector<8x32xf32>
    %194 = vector.broadcast %173 : vector<1x32xf32> to vector<8x32xf32>
    %195 = arith.addf %193, %194 : vector<8x32xf32>
    %c0_77 = arith.constant 0 : index
    %c0_78 = arith.constant 0 : index
    %c0_79 = arith.constant 0 : index
    %196 = vector.load %arg23[%c0_77, %c0_78, %c0_79] : memref<1x8x32xf32, #tpu.memory_space<vmem>>, vector<1x8x32xf32>
    %197 = vector.shape_cast %196 : vector<1x8x32xf32> to vector<8x32xf32>
    %198 = vector.shape_cast %195 : vector<8x32xf32> to vector<1x8x32xf32>
    tpu.vector_store %arg23[%c0_77, %c0_78, %c0_79], %198 {strides = array<i32>} : memref<1x8x32xf32, #tpu.memory_space<vmem>>, vector<1x8x32xf32>,
    return
  }
  func.func @transform_0(%arg0: i32, %arg1: i32) -> (i32, i32, i32) {
    %c0_i32 = arith.constant 0 : i32
    %c0_i32_0 = arith.constant 0 : i32
    %c0_i32_1 = arith.constant 0 : i32
    return %arg0, %c0_i32, %c0_i32_0 : i32, i32, i32
  }
  func.func @transform_1(%arg0: i32, %arg1: i32) -> (i32, i32, i32) {
    %c0_i32 = arith.constant 0 : i32
    %c0_i32_0 = arith.constant 0 : i32
    %c0_i32_1 = arith.constant 0 : i32
    return %arg0, %c0_i32, %c0_i32_0 : i32, i32, i32
  }
  func.func @transform_2(%arg0: i32, %arg1: i32) -> (i32, i32) {
    %c0_i32 = arith.constant 0 : i32
    %c0_i32_0 = arith.constant 0 : i32
    %c0_i32_1 = arith.constant 0 : i32
    return %c0_i32, %c0_i32_0 : i32, i32
  }
  func.func @transform_3(%arg0: i32, %arg1: i32) -> (i32, i32) {
    %c0_i32 = arith.constant 0 : i32
    %c0_i32_0 = arith.constant 0 : i32
    %c0_i32_1 = arith.constant 0 : i32
    return %c0_i32, %c0_i32_0 : i32, i32
  }
  func.func @transform_4(%arg0: i32, %arg1: i32) -> (i32, i32) {
    %c0_i32 = arith.constant 0 : i32
    %c0_i32_0 = arith.constant 0 : i32
    %c0_i32_1 = arith.constant 0 : i32
    return %c0_i32, %c0_i32_0 : i32, i32
  }
  func.func @transform_5(%arg0: i32, %arg1: i32) -> (i32, i32) {
    %c0_i32 = arith.constant 0 : i32
    %c0_i32_0 = arith.constant 0 : i32
    %c0_i32_1 = arith.constant 0 : i32
    return %c0_i32, %c0_i32_0 : i32, i32
  }
  func.func @transform_6(%arg0: i32, %arg1: i32) -> (i32, i32) {
    %c0_i32 = arith.constant 0 : i32
    %c0_i32_0 = arith.constant 0 : i32
    %c0_i32_1 = arith.constant 0 : i32
    return %c0_i32, %c0_i32_0 : i32, i32
  }
  func.func @transform_7(%arg0: i32, %arg1: i32) -> (i32, i32) {
    %c0_i32 = arith.constant 0 : i32
    %c0_i32_0 = arith.constant 0 : i32
    %c0_i32_1 = arith.constant 0 : i32
    return %c0_i32, %c0_i32_0 : i32, i32
  }
  func.func @transform_8(%arg0: i32, %arg1: i32) -> (i32, i32) {
    %c0_i32 = arith.constant 0 : i32
    %c0_i32_0 = arith.constant 0 : i32
    %c0_i32_1 = arith.constant 0 : i32
    return %c0_i32, %c0_i32_0 : i32, i32
  }
  func.func @transform_9(%arg0: i32, %arg1: i32) -> (i32, i32, i32) {
    %c0_i32 = arith.constant 0 : i32
    %c0_i32_0 = arith.constant 0 : i32
    %c0_i32_1 = arith.constant 0 : i32
    return %arg1, %c0_i32, %c0_i32_0 : i32, i32, i32
  }
  func.func @transform_10(%arg0: i32, %arg1: i32) -> (i32, i32, i32) {
    %c0_i32 = arith.constant 0 : i32
    %c0_i32_0 = arith.constant 0 : i32
    %c0_i32_1 = arith.constant 0 : i32
    return %arg1, %c0_i32, %c0_i32_0 : i32, i32, i32
  }
  func.func @transform_11(%arg0: i32, %arg1: i32) -> (i32, i32, i32) {
    %c0_i32 = arith.constant 0 : i32
    %c0_i32_0 = arith.constant 0 : i32
    %c0_i32_1 = arith.constant 0 : i32
    return %arg1, %c0_i32, %c0_i32_0 : i32, i32, i32
  }
  func.func @transform_12(%arg0: i32, %arg1: i32) -> (i32, i32, i32) {
    %c0_i32 = arith.constant 0 : i32
    %c0_i32_0 = arith.constant 0 : i32
    %c0_i32_1 = arith.constant 0 : i32
    return %arg1, %c0_i32, %c0_i32_0 : i32, i32, i32
  }
  func.func @transform_13(%arg0: i32, %arg1: i32) -> (i32, i32, i32) {
    %c0_i32 = arith.constant 0 : i32
    %c0_i32_0 = arith.constant 0 : i32
    %c0_i32_1 = arith.constant 0 : i32
    return %arg1, %c0_i32, %c0_i32_0 : i32, i32, i32
  }
  func.func @transform_14(%arg0: i32, %arg1: i32) -> (i32, i32, i32) {
    %c0_i32 = arith.constant 0 : i32
    %c0_i32_0 = arith.constant 0 : i32
    %c0_i32_1 = arith.constant 0 : i32
    return %arg1, %c0_i32, %c0_i32_0 : i32, i32, i32
  }
  func.func @transform_15(%arg0: i32, %arg1: i32) -> (i32, i32, i32) {
    %c0_i32 = arith.constant 0 : i32
    %c0_i32_0 = arith.constant 0 : i32
    %c0_i32_1 = arith.constant 0 : i32
    return %arg1, %c0_i32, %c0_i32_0 : i32, i32, i32
  }
  func.func @transform_16(%arg0: i32, %arg1: i32) -> (i32, i32, i32) {
    %c0_i32 = arith.constant 0 : i32
    %c0_i32_0 = arith.constant 0 : i32
    %c0_i32_1 = arith.constant 0 : i32
    return %arg1, %c0_i32, %c0_i32_0 : i32, i32, i32
  }
  func.func @transform_17(%arg0: i32, %arg1: i32) -> (i32, i32, i32) {
    %c0_i32 = arith.constant 0 : i32
    %c0_i32_0 = arith.constant 0 : i32
    %c0_i32_1 = arith.constant 0 : i32
    return %arg1, %c0_i32, %c0_i32_0 : i32, i32, i32
  }
  func.func @transform_18(%arg0: i32, %arg1: i32) -> (i32, i32, i32) {
    %c0_i32 = arith.constant 0 : i32
    %c0_i32_0 = arith.constant 0 : i32
    %c0_i32_1 = arith.constant 0 : i32
    return %arg1, %c0_i32, %c0_i32_0 : i32, i32, i32
  }
  func.func @transform_19(%arg0: i32, %arg1: i32) -> (i32, i32, i32) {
    %c0_i32 = arith.constant 0 : i32
    %c0_i32_0 = arith.constant 0 : i32
    %c0_i32_1 = arith.constant 0 : i32
    return %arg1, %c0_i32, %c0_i32_0 : i32, i32, i32
  }
  func.func @transform_20(%arg0: i32, %arg1: i32) -> (i32, i32, i32) {
    %c0_i32 = arith.constant 0 : i32
    %c0_i32_0 = arith.constant 0 : i32
    %c0_i32_1 = arith.constant 0 : i32
    return %arg1, %c0_i32, %c0_i32_0 : i32, i32, i32
  }
  func.func @transform_21(%arg0: i32, %arg1: i32) -> (i32, i32, i32) {
    %c0_i32 = arith.constant 0 : i32
    %c0_i32_0 = arith.constant 0 : i32
    %c0_i32_1 = arith.constant 0 : i32
    return %arg0, %c0_i32, %c0_i32_0 : i32, i32, i32
  }
}

</mosaic_0001>

<bundles_post_ra>
// kernel: tpu_custom_call.1
= control target key start
LH: loop header
LB: loop body
LE: loop exit
PB: predicated region body
PF: predicated region fallthrough
CT: control target
= control target key end

     0   :  { %s3577_s0 = inlined_call_operand.vmem [shape: f32[2,8,48], index: 0, kind: input, shape index: {}]   ;;  %s3578_s1 = inlined_call_operand.vmem [shape: f32[2,1,8], index: 1, kind: input, shape index: {}]   ;;  %s3579_s2 = inlined_call_operand.vmem [shape: f32[8,32], index: 2, kind: input, shape index: {}]   ;;  %s3580_s3 = inlined_call_operand.hbm [shape: f32[1,48], index: 3, kind: input, shape index: {}]   ;;  %s3581_s4 = inlined_call_operand.hbm [shape: f32[1,48], index: 4, kind: input, shape index: {}]   ;;  %s3582_s5 = inlined_call_operand.vmem [shape: bf16[48,32], index: 5, kind: input, shape index: {}]   ;;  %s3583_s6 = inlined_call_operand.hbm [shape: f32[1,32], index: 6, kind: input, shape index: {}]   ;;  %s3584_s7 = inlined_call_operand.hbm [shape: f32[1,32], index: 7, kind: input, shape index: {}]   ;;  %s3585_s8 = inlined_call_operand.hbm [shape: f32[1,32], index: 8, kind: input, shape index: {}]   ;;  %s3586_s9 = inlined_call_operand.vmem [shape: bf16[2,32,96], index: 9, kind: input, shape index: {}]   ;;  %s3587_s10 = inlined_call_operand.vmem [shape: f32[2,1,96], index: 10, kind: input, shape index: {}]   ;;  %s3588_s11 = inlined_call_operand.vmem [shape: bf16[2,32,32], index: 11, kind: input, shape index: {}]   ;;  %s3589_s12 = inlined_call_operand.vmem [shape: f32[2,1,32], index: 12, kind: input, shape index: {}]   ;;  %s3590_s13 = inlined_call_operand.hbm [shape: f32[2,1,32], index: 13, kind: input, shape index: {}]   ;;  %s3591_s14 = inlined_call_operand.vmem [shape: f32[2,1,32], index: 14, kind: input, shape index: {}]   ;;  %s3592_s15 = inlined_call_operand.vmem [shape: bf16[2,32,64], index: 15, kind: input, shape index: {}]   ;;  %s3593_s16 = inlined_call_operand.vmem [shape: f32[2,1,64], index: 16, kind: input, shape index: {}]   ;;  %s3594_s17 = inlined_call_operand.vmem [shape: bf16[2,64,32], index: 17, kind: input, shape index: {}]   ;;  %s3595_s18 = inlined_call_operand.vmem [shape: f32[2,1,32], index: 18, kind: input, shape index: {}]   ;;  %s3596_s19 = inlined_call_operand.vmem [shape: f32[2,1,32], index: 19, kind: input, shape index: {}]   ;;  %s3597_s20 = inlined_call_operand.vmem [shape: f32[2,1,32], index: 20, kind: input, shape index: {}]   ;;  %s3598_s21 = inlined_call_operand.hbm [shape: f32[2,8,32], index: 21, kind: output, shape index: {}]  }
   0x1   :  { %3619 = sst [smem:[#allocation33_spill]] %s3577_s0 }
   0x2   :  { %3620 = sst [smem:[#allocation34_spill]] %s3578_s1 }
   0x3   :  { %3621 = sst [smem:[#allocation35_spill]] %s3579_s2 }
   0x4   :  { %3622 = sst [smem:[#allocation36_spill]] %s3580_s3 }
   0x5   :  { %3623 = sst [smem:[#allocation37_spill]] %s3581_s4 }
   0x6   :  { %3624 = sst [smem:[#allocation38_spill]] %s3582_s5 }
   0x7   :  { %3625 = sst [smem:[#allocation39_spill]] %s3583_s6 }
   0x8   :  { %3626 = sst [smem:[#allocation40_spill]] %s3584_s7 }
   0x9   :  { %3627 = sst [smem:[#allocation41_spill]] %s3585_s8 }
   0xa   :  { %3628 = sst [smem:[#allocation42_spill]] %s3586_s9 }
   0xb   :  { %3629 = sst [smem:[#allocation43_spill]] %s3587_s10 }
   0xc   :  { %3630 = sst [smem:[#allocation44_spill]] %s3588_s11 }
   0xd   :  { %3631 = sst [smem:[#allocation45_spill]] %s3589_s12 }
   0xe   :  { %3632 = sst [smem:[#allocation46_spill]] %s3590_s13 }
   0xf   :  { %3633 = sst [smem:[#allocation47_spill]] %s3591_s14 }
  0x10   :  { %3634 = sst [smem:[#allocation48_spill]] %s3592_s15 }
  0x11   :  { %3635 = sst [smem:[#allocation49_spill]] %s3593_s16 }
  0x12   :  { %3636 = sst [smem:[#allocation50_spill]] %s3594_s17 }
  0x13   :  { %3637 = sst [smem:[#allocation51_spill]] %s3595_s18 }
  0x14   :  { %3638 = sst [smem:[#allocation52_spill]] %s3596_s19 }
  0x15   :  { %3639 = sst [smem:[#allocation53_spill]] %s3597_s20 }
  0x16   :  { %3640 = sst [smem:[#allocation54_spill]] %s3598_s21 }
  0x17   :  { %26 = vsyncpa [#allocation3], 0 }
  0x18   :  { %27 = vsyncpa [#allocation6], 0 }
  0x19   :  { %28 = vsyncpa [#allocation9], 0 }
  0x1a   :  { %29 = vsyncpa [#allocation12], 0 }
  0x1b   :  { %31 = vsyncpa [#allocation12 + $0x1], 0 }
  0x1c   :  { %32 = vsyncpa [#allocation4], 0 }
  0x1d   :  { %34 = vsyncpa [#allocation4 + $0x1], 0  ;;  %s3072_s2 = smov 0   ;;  %s3074_s25 = smov 0  }
  0x1e   :  { %s3076_s26 = smov 0   ;;  %s3078_s27 = smov 0  }
  0x1f   :  { %s3080_s3 = smov 0   ;;  %s3082_s28 = smov 0  }
  0x20   :  { %s3084_s29 = smov 0   ;;  %s3086_s0 = smov 0  }
  0x21   :  { %s3088_s4 = smov 0   ;;  %s3090_s30 = smov 0  }
  0x22   :  { %s3092_s5 = smov 0  }
  0x23 LB: > { %3641 = sst [smem:[#allocation19_spill]] %s2901_s2  ;;  %s2943_s22 = smov [#allocation5]   ;;  %s2941_s5 = sphi %s3092_s5, %s40_s5   ;;  %s2937_s30 = sphi %s3090_s30, %s3719_s30   ;;  %s2933_s4 = sphi %s3088_s4, %s3718_s4   ;;  %s2929_s0 = sphi %s3086_s0, %s3717_s0   ;;  %s2925_s29 = sphi %s3084_s29, %s3716_s29   ;;  %s2921_s28 = sphi %s3082_s28, %s3715_s28   ;;  %s2917_s3 = sphi %s3080_s3, %s3714_s3   ;;  %s2913_s27 = sphi %s3078_s27, %s3713_s27   ;;  %s2909_s26 = sphi %s3076_s26, %s3712_s26   ;;  %s2905_s25 = sphi %s3074_s25, %s3711_s25   ;;  %s2901_s2 = sphi %s3072_s2, %s3710_s2  }
  0x24   : > { %3642 = sst [smem:[#allocation20_spill]] %s2905_s25  ;;  %s621_s23 = sshll.u32 %s2943_s22, 4  ;;  %s622_s23 = int_to_ptr.vmem [resolvable:$true] %s621_s23 }
  0x25   : > { %3643 = sst [smem:[#allocation21_spill]] %s2909_s26  ;;  %s2243_s1 = sadd.s32 4294967295, %s2941_s5  }
  0x26   : > { %3644 = sst [smem:[#allocation22_spill]] %s2917_s3  ;;  %p2245_p0 = scmp.ge.s32.totalorder %s2941_s5, 1 }
  0x27   : > { %3645 = sst [smem:[#allocation23_spill]] %s2921_s28  ;;  %p3129_p1 = scmp.eq.s32.totalorder %s2243_s1, 0 }
  0x28   : > { %3646 = sst [smem:[#allocation24_spill]] %s2933_s4  ;;  %p3133_p2 = scmp.eq.s32.totalorder %s2243_s1, 3 }
  0x29   : > { %3647 = sst [smem:[#allocation25_spill]] %s2937_s30  ;;  %p594_p3 = scmp.lt.s32.totalorder %s2941_s5, 5 }
  0x2a   : > { %3648 = sst [smem:[#allocation26_spill]] %s2941_s5  ;;  %s2944_s19 = smov [#allocation8]  }
  0x2b   : > { %s3649_s24 = scalar_select %p3129_p1, 1, 0 }
  0x2c   : > { %s3650_s21 = scalar_select %p3133_p2, 1, 0 }
  0x2d   : > { %p3138_p4 = pnand %p2245_p0, %p594_p3  ;;  %s646_s22 = sshll.u32 %s2944_s19, 4  ;;  %s647_s22 = int_to_ptr.vmem [resolvable:$true] %s646_s22 }
  0x2e   : > { %s2945_s1 = smov [#allocation2]   ;;  %s2662_s15 = scalar_lea.vmem %s622_s23, 16 }
  0x2f   : > { %s3651_s20 = scalar_select %p3138_p4, 1, 0 }
  0x30   : > { %p2469_p5 = pneg %p3138_p4  ;;  %s610_s17 = sshll.u32 %s2945_s1, 4  ;;  %s611_s17 = int_to_ptr.vmem [resolvable:$true] %s610_s17 }
  0x31   : > { %p2663_p8 = scmp.ne.s32.totalorder %s622_s23, %s2662_s15  ;;  %s2669_s19 = scalar_lea.vmem %s622_s23, 32 }
  0x32   : > { %p3146_p6 = pnand %p2469_p5, %p3129_p1  ;;  %p2670_p11 = scmp.lt.s32.totalorder %s622_s23, %s622_s23 }
  0x33   : > { %p2671_p12 = scmp.lt.s32.totalorder %s2669_s19, %s2662_s15 }
  0x34   : > { %p3152_p7 = pneg %p3146_p6 }
  0x35   : > { %p2672_p13 = por %p2671_p12, %p2670_p11 }
  0x36   : > { %p2665_p9 = pnand %p2663_p8, %p3152_p7 }
  0x38   : > { %p2666_p10 = pneg %p2665_p9 }
  0x3a   : > { %p2673_p0 = pnand %p2672_p13, %p2666_p10 }
  0x3c   : > { %2676 = shalt.err (!%p2673_p0)
}
  0x3d   : > { %s3654_s12 = sld [smem:[#allocation37_spill]]  ;;  %s2688_s11 = scalar_lea.vmem %s647_s22, 16 }
  0x3e   : > { %p2689_p3 = scmp.ne.s32.totalorder %s647_s22, %s2688_s11  ;;  %s2695_s10 = scalar_lea.vmem %s647_s22, 32 }
  0x3f   : > { %p2696_p8 = scmp.lt.s32.totalorder %s647_s22, %s647_s22  ;;  %p2697_p9 = scmp.lt.s32.totalorder %s2695_s10, %s2688_s11 }
  0x40   : > { %p2691_p5 = pnand %p2689_p3, %p3152_p7 }
  0x41   : > { %p2698_p2 = por %p2697_p9, %p2696_p8 }
  0x42   : > { %p2692_p4 = pneg %p2691_p5 }
  0x43   : > { %2475 = dma.hbm_to_vmem [thread:$0]  (!%p3146_p6), %s3654_s12, 16, %s622_s23, [#allocation6]  }
  0x44   : > { %p2699_p1 = pnand %p2698_p2, %p2692_p4 }
  0x46   : > { %2702 = shalt.err (!%p2699_p1)
}
  0x47   : > { %s3655_s7 = sld [smem:[#allocation40_spill]]  ;;  %s2946_s12 = smov [#allocation7]  }
  0x48   : > { %s635_s14 = sshll.u32 %s2946_s12, 4  ;;  %s2714_s23 = scalar_lea.vmem %s611_s17, 16  ;;  %s636_s14 = int_to_ptr.vmem [resolvable:$true] %s635_s14 }
  0x49   : > { %p2715_p10 = scmp.ne.s32.totalorder %s611_s17, %s2714_s23  ;;  %s2721_s1 = scalar_lea.vmem %s611_s17, 32 }
  0x4a   : > { %p2722_p13 = scmp.lt.s32.totalorder %s611_s17, %s611_s17  ;;  %p2723_p0 = scmp.lt.s32.totalorder %s2721_s1, %s2714_s23 }
  0x4b   : > { %p2717_p11 = pnand %p2715_p10, %p3152_p7 }
  0x4c   : > { %p2724_p2 = por %p2723_p0, %p2722_p13 }
  0x4d   : > { %2481 = dma.hbm_to_vmem [thread:$0]  (!%p3146_p6), %s3655_s7, 16, %s647_s22, [#allocation9]  }
  0x4e   : > { %p2718_p12 = pneg %p2717_p11 }
  0x50   : > { %p2725_p1 = pnand %p2724_p2, %p2718_p12 }
  0x52   : > { %2728 = shalt.err (!%p2725_p1)
}
  0x53   : > { %s3656_s15 = sld [smem:[#allocation36_spill]]  ;;  %s2740_s22 = scalar_lea.vmem %s636_s14, 16 }
  0x54   : > { %p2741_p4 = scmp.ne.s32.totalorder %s636_s14, %s2740_s22  ;;  %s2747_s19 = scalar_lea.vmem %s636_s14, 32 }
  0x55   : > { %p2748_p8 = scmp.lt.s32.totalorder %s636_s14, %s636_s14  ;;  %p2749_p9 = scmp.lt.s32.totalorder %s2747_s19, %s2740_s22 }
  0x56   : > { %p2743_p3 = pnand %p2741_p4, %p3152_p7 }
  0x57   : > { %p2750_p10 = por %p2749_p9, %p2748_p8 }
  0x58   : > { %p2744_p5 = pneg %p2743_p3 }
  0x59   : > { %2472 = dma.hbm_to_vmem [thread:$0]  (!%p3146_p6), %s3656_s15, 16, %s611_s17, [#allocation3]  }
  0x5a   : > { %p2751_p11 = pnand %p2750_p10, %p2744_p5 }
  0x5c   : > { %2754 = shalt.err (!%p2751_p11)
}
  0x5d   : > { %s3657_s6 = sld [smem:[#allocation39_spill]]  ;;  %s2947_s17 = smov [#allocation10]  }
  0x5e   : > { %s657_s1 = sshll.u32 %s2947_s17, 4  ;;  %s658_s1 = int_to_ptr.vmem [resolvable:$true] %s657_s1 }
  0x5f   : > { %s2766_s10 = scalar_lea.vmem %s658_s1, 16  ;;  %s2773_s11 = scalar_lea.vmem %s658_s1, 32 }
  0x60   : > { %p2767_p12 = scmp.ne.s32.totalorder %s658_s1, %s2766_s10  ;;  %p2774_p2 = scmp.lt.s32.totalorder %s658_s1, %s658_s1 }
  0x61   : > { %p2775_p1 = scmp.lt.s32.totalorder %s2773_s11, %s2766_s10 }
  0x62   : > { %p2769_p13 = pnand %p2767_p12, %p3152_p7 }
  0x63   : > { %2478 = dma.hbm_to_vmem [thread:$0]  (!%p3146_p6), %s3657_s6, 16, %s636_s14, [#allocation6]  }
  0x64   : > { %p2770_p0 = pneg %p2769_p13  ;;  %p2776_p4 = por %p2775_p1, %p2774_p2 }
  0x66   : > { %p2777_p3 = pnand %p2776_p4, %p2770_p0 }
  0x68   : > { %2780 = shalt.err (!%p2777_p3)
}
  0x69   : > { %s3658_s8 = sld [smem:[#allocation41_spill]]  ;;  %s2244_s16 = sadd.s32 4294967294, %s2941_s5  }
  0x6a   : > { %s49_s14 = sadd.s32 1, %s2933_s4  ;;  %s52_s18 = sadd.s32 1, %s2937_s30 }
  0x6b   : > { %p50_p7 = scmp.ge.s32.totalorder %s49_s14, 2  ;;  %s362_s19 = sadd.s32 1, %s2921_s28 }
  0x6c   : > { %p369_p5 = scmp.ne.s32.totalorder %s2921_s28, %s2917_s3  ;;  %p375_p11 = scmp.ne.s32.totalorder %s2917_s3, %s2913_s27 }
  0x6d   : > { %s3721_s14 = smov (%p50_p7, %s49_s14), 0  ;;  %s3723_s18 = smov (!%p50_p7, %s52_s18), %s2937_s30 }
  0x6e   : > { %3659 = sst [smem:[#allocation27_spill]] %s3721_s14  ;;  %s359_s12 = ssub.s32 %s2933_s4, %s3721_s14 }
  0x6f   : > { %2484 = dma.hbm_to_vmem [thread:$0]  (!%p3146_p6), %s3658_s8, 16, %s658_s1, [#allocation9]  }
  0x70   : > { %p370_p6 = scmp.eq.s32.totalorder %s2941_s5, 0  ;;  %p54_p8 = scmp.ge.s32.totalorder %s3723_s18, 2 }
  0x71   : > { %p360_p9 = scmp.eq.s32.totalorder %s359_s12, 0  ;;  %p3663_p12 = scmp.ne.s32.totalorder %s3649_s24, 0 }
  0x72   : > { %p3203_p10 = por %p370_p6, %p369_p5  ;;  %s3725_s18 = smov (%p54_p8, %s3723_s18), 0 }
  0x73   : > { %3661 = sst [smem:[#allocation28_spill]] %s3725_s18  ;;  %p3216_p13 = por %p3663_p12, %p375_p11 }
  0x74   : > { %s3212_s17 = scalar_select %p360_p9, %s2921_s28, %s362_s19  }
  0x75   : > { %s567_s10 = ssub.s32 %s2937_s30, %s3725_s18  ;;  %s570_s11 = sadd.s32 1, %s2909_s26 }
  0x76   : > { %3662 = sst [smem:[#allocation29_spill]] %s3212_s17  ;;  %p568_p0 = scmp.eq.s32.totalorder %s567_s10, 0 }
  0x77   : > { %p580_p2 = scmp.ne.s32.totalorder %s2909_s26, %s2905_s25  ;;  %p586_p1 = scmp.ne.s32.totalorder %s2905_s25, %s2901_s2 }
  0x78   : > { %s3228_s15 = scalar_select %p568_p0, %s2909_s26, %s570_s11  }
  0x79   : > { %p3666_p4 = scmp.ne.s32.totalorder %s3650_s21, 0  ;;  %p587_p7 = scmp.eq.s32.totalorder %s2244_s16, 3 }
  0x7a   : > { %3665 = sst [smem:[#allocation30_spill]] %s3228_s15  ;;  %p2498_p5 = scmp.lt.s32.totalorder %s2941_s5, 4 }
  0x7b   : > { %p3232_p3 = por %p3666_p4, %p580_p2  ;;  %s709_s22 = sand.u32 1, %s2921_s28  }
  0x7c   : > { %p3238_p6 = por %p587_p7, %p586_p1  ;;  %s2252_s12 = sshll.u32 %s2933_s4, 4 }
  0x7d   : > { %s3667_s27 = scalar_select %p3232_p3, 1, 0 }
  0x7e   : > { %s3669_s19 = scalar_select %p3238_p6, 1, 0 }
  0x7f   : > { %3668 = sst [smem:[#allocation31_spill]] %s3667_s27  ;;  %s712_s8 = scalar_lea.vmem [#allocation11], %s709_s22 }
  0x80   : > { %3670 = sst [smem:[#allocation32_spill]] %s3669_s19  ;;  %s719_s11 = sshll.u32 %s712_s8, 4  ;;  %s720_s11 = int_to_ptr.vmem [resolvable:$true] %s719_s11 }
  0x81   : > { %s3671_s13 = sld [smem:[#allocation46_spill]]  ;;  %p3248_p8 = pnand %p2498_p5, %p3203_p10 }
  0x82   : > { %s710_s16 = scalar_lea.sflag [#allocation12], %s709_s22  ;;  %s2794_s18 = scalar_lea.vmem %s720_s11, 16 }
  0x83   : > { %p2783_p9 = pneg %p3248_p8  ;;  %p2795_p11 = scmp.ne.s32.totalorder %s720_s11, %s2794_s18 }
  0x84   : > { %s2948_s14 = smov [#allocation11]  }
  0x85   : > { %p2797_p12 = pnand %p2795_p11, %p2783_p9  ;;  %s2799_s30 = sshll.u32 %s2948_s14, 4  ;;  %s2800_s30 = int_to_ptr.vmem [resolvable:$false] %s2799_s30 }
  0x86   : > { %s2801_s6 = scalar_lea.vmem %s2800_s30, 32  ;;  %p2802_p2 = scmp.lt.s32.totalorder %s720_s11, %s2800_s30 }
  0x87   : > { %s717_s7 = scalar_lea.hbm %s3671_s13, %s2252_s12  ;;  %p2798_p0 = pneg %p2797_p12 }
  0x88   : > { %p2803_p1 = scmp.lt.s32.totalorder %s2801_s6, %s2794_s18 }
  0x8a   : > { %p2804_p4 = por %p2803_p1, %p2802_p2 }
  0x8c   : > { %p2805_p7 = pnand %p2804_p4, %p2798_p0 }
  0x8e   : > { %2808 = shalt.err (!%p2805_p7)
}
  0x8f   : > { %2488 = dma.hbm_to_vmem [thread:$0]  (!%p3248_p8), %s717_s7, 16, %s720_s11, %s710_s16  }
  0x90   : > { %p3673_p10 = scmp.ne.s32.totalorder %s3651_s20, 0 }
  0x91   : > { %p3674_p5 = scmp.ne.s32.totalorder (!%p3673_p10), %s3649_s24, 0 }
  0x92   : > { %774 = sbr.rel (%p3673_p10) target bundleno = 3542 (0xdd6), region = 104 }
  0x97   : > { %2880 = dma.done.wait (%p3674_p5), [#allocation3], 16  }
  0x98   : > { %2882 = vsyncadd (%p3674_p5), [#allocation3], 4294967280 }
  0x99   : > { %2884 = dma.done.wait (%p3674_p5), [#allocation6], 32  }
  0x9a   : > { %2886 = vsyncadd (%p3674_p5), [#allocation6], 4294967264 }
  0x9b   : > { %2888 = dma.done.wait (%p3674_p5), [#allocation9], 32  }
  0x9c   : > { %2890 = vsyncadd (%p3674_p5), [#allocation9], 4294967264  ;;  %s796_s7 = sand.u32 1, %s2917_s3  }
  0x9d   : > { %s797_s8 = scalar_lea.sflag [#allocation12], %s796_s7  ;;  %s3271_s20 = scalar_lea.vmem [#allocation11], %s796_s7 }
  0x9e   : > { %2892 = dma.done.wait (%p3216_p13), %s797_s8, 16  }
  0x9f   : > { %2894 = vsyncadd (%p3216_p13), %s797_s8, 4294967280  ;;  %s3607_s30 = sand.u32 1, %s2905_s25   ;;  %p905_p8 = scmp.lt.s32.totalorder %s2929_s0, 1 }
  0xa0   : > { %s2259_s24 = sshll.u32 %s3607_s30, 3  ;;  %p912_p9 = scmp.lt.s32.totalorder %s2925_s29, 1 }
  0xa1   : > { %s3283_s14 = scalar_select %p905_p8, %s2929_s0, 1 }
  0xa2   : > { %s3286_s18 = scalar_select %p912_p9, %s2925_s29, 1 }
  0xa3   : > { %s2260_s23 = sshll.u32 %s3283_s14, 3  ;;  %s3676_s16 = sld [smem:[#allocation33_spill]] }
  0xa4   : > { %s2313_s7 = sshll.u32 %s3286_s18, 4  ;;  %s3677_s9 = sld [smem:[#allocation42_spill]] }
  0xa5   : > { %s3679_s19 = sld [smem:[#allocation44_spill]]  ;;  %s2316_s26 = sshll.u32 %s3286_s18, 5 }
  0xa6   : > { %s3683_s17 = sld [smem:[#allocation49_spill]]  ;;  %s3346_s4 = scalar_lea.vmem [#allocation13], %s2259_s24 }
  0xa7   : > { %s3684_s27 = sld [smem:[#allocation50_spill]]  ;;  %p2269_p13 = scmp.ne.s32.totalorder %s2925_s29, 0 }
  0xa8   : > { %s3685_s12 = sld [smem:[#allocation51_spill]] }
  0xa9   : > { %s908_s6 = scalar_lea.vmem %s3676_s16, %s2260_s23  ;;  %s3686_s10 = sld [smem:[#allocation52_spill]] }
  0xaa   : > { %s3300_s13 = scalar_lea.vmem %s3677_s9, %s2313_s7  ;;  %s3682_s9 = sld [smem:[#allocation48_spill]] }
  0xab   : > { %s3309_s2 = scalar_lea.vmem %s3679_s19, %s2313_s7  ;;  %s3687_s8 = sld [smem:[#allocation53_spill]] }
  0xac   : > { %s938_s3 = scalar_lea.vmem %s3683_s17, %s3286_s18  ;;  %s3688_s28 = sld [smem:[#allocation38_spill]] (!%p2269_p13) }
  0xad   : > { %s3332_s25 = scalar_lea.vmem %s3684_s27, %s2316_s26  ;;  %957 = sbr.rel (%p2269_p13) target bundleno = 997 (0x3e5), region = 132 }
  0xae   : > { %s946_s23 = scalar_lea.vmem %s3685_s12, %s3286_s18  ;;  %s3690_s1 = sld [smem:[#allocation35_spill]] (!%p2269_p13) }
  0xaf   : > { %s949_s30 = scalar_lea.vmem %s3686_s10, %s3286_s18 }
  0xb0   : > { %s3322_s5 = scalar_lea.vmem %s3682_s9, %s2313_s7 }
  0xb1   : > { %s952_s11 = scalar_lea.vmem %s3687_s8, %s3286_s18 }
  0xb2   : > { %v958_v0 = vld [vmem:[%s908_s6] sm:$0xff]  ;;  %vm961_vm0 = vcmask 392192   ;;  %s3689_s17 = smov %s3688_s28  ;;  %v2610_v7 = vld [vmem:[%s3688_s28 + $0x10] sm:$0xff]   ;;  %v2949_v8 = vmov 0.0   ;;  %vm2950_vm1 = vmmov 0   ;;  %vm1068_vm2 = vcmask 261120  }
  0xb3   : > { %v962_v1 = vsel %vm961_vm0, %v958_v0, 0.0  ;;  %2351 = vmatprep.subr.bf16.mxu0 %v2949_v8  ;;  %2357 = vmatprep.mubr.msk.bf16.mxu0 %vm2950_vm1, %v2949_v8  ;;  %v2611_v9 = vld [vmem:[%s3689_s17 + $0x8] sm:$0xff]   ;;  %v2612_v10 = vld [vmem:[%s3689_s17] sm:$0xff]  }
  0xb4   : > { %963 = vadd.xlane.f32.xlu0 %v962_v1  ;;  %2352 = vmatpush3.bf16.msra.mxu0 %v2610_v7  ;;  %v2270_v15 = vld [vmem:[#allocation2] ss:$0 sm:$0xff]  ;;  %v2271_v17 = vld [vmem:[#allocation5] ss:$0 sm:$0xff]  ;;  %v2272_v21 = vld [vmem:[#allocation7] ss:$0 sm:$0xff] }
  0xb5   : > { %2353 = vmatprep.subr.bf16.mxu0 %v2949_v8  ;;  %v2277_v38 = vld [vmem:[#allocation8] ss:$0 sm:$0xff]  ;;  %v2278_v40 = vld [vmem:[#allocation10] ss:$0 sm:$0xff] }
  0xb6   : > { %v1097_v42 = vld [vmem:[%s3690_s1] sm:$0xff] }
  0xb8   : > { %2354 = vmatpush3.bf16.msra.mxu0 %v2611_v9 }
  0xb9   : > { %2355 = vmatprep.subr.bf16.mxu0 %v2949_v8 }
  0xbc   : > { %2356 = vmatpush3.bf16.msra.mxu0 %v2612_v10 }
 0x13d   : > { %v964_v2 = vpop.xlane.xlu0 %963 }
 0x13e   : > { %v966_v3 = vmul.f32 0.020833334, %v964_v2 }
 0x140   : > { %v967_v4 = vsub.f32 %v958_v0, %v966_v3 }
 0x142   : > { %v968_v5 = vmul.f32 %v967_v4, %v967_v4 }
 0x144   : > { %v969_v6 = vsel %vm961_vm0, %v968_v5, 0.0 }
 0x145   : > { %970 = vadd.xlane.f32.xlu0 %v969_v6 }
 0x1ce   : > { %v971_v11 = vpop.xlane.xlu0 %970 }
 0x1cf   : > { %v972_v12 = vmul.f32 0.020833334, %v971_v11 }
 0x1d1   : > { %v973_v13 = vadd.f32 1e-12, %v972_v12 }
 0x1d3   : > { %2613 = vrsqrt.f32 %v973_v13 }
 0x1e0   : > { %v2614_v14 = vpop.eup %2613 }
 0x1e1   : > { %v975_v16 = vmul.f32 %v2614_v14, %v967_v4 }
 0x1e3   : > { %v982_v18 = vmul.f32 %v2270_v15, %v975_v16 }
 0x1e5   : > { %v989_v19 = vadd.f32 %v2271_v17, %v982_v18 }
 0x1e7   : > { %v990_v20 = vpack.c.bf16 %v989_v19, %v989_v19 }
 0x1e9   : > { %2358 = vmatmul.mubr.msk.bf16.vlgmr.msra.gmra.mxu0 %vm961_vm0, %v990_v20 }
 0x2a9   : > { %v1059_v22 = vpop.f32.mrf.mxu0 }
 0x2aa   : > { %v1060_v23 = vadd.f32 %v2272_v21, %v1059_v22 }
 0x2ab   : > { %v2359_v24 = vpop.f32.mrf.mxu0 }
 0x2ac   : > { %v1065_v25 = vmax.f32 %v1060_v23, 0.0 }
 0x2ad   : > { %v1062_v26 = vpop.f32.mrf.mxu0 }
 0x2ae   : > { %v1069_v27 = vsel %vm1068_vm2, %v1065_v25, 0.0 }
 0x2af   : > { %1070 = vadd.xlane.f32.xlu1 %v1069_v27  ;;  %v2360_v28 = vpop.f32.mrf.mxu0 }
 0x338   : > { %v1071_v29 = vpop.xlane.xlu1 %1070 }
 0x339   : > { %v1073_v30 = vmul.f32 0.03125, %v1071_v29 }
 0x33b   : > { %v1074_v31 = vsub.f32 %v1065_v25, %v1073_v30 }
 0x33d   : > { %v1075_v32 = vmul.f32 %v1074_v31, %v1074_v31 }
 0x33f   : > { %v1076_v33 = vsel %vm1068_vm2, %v1075_v32, 0.0 }
 0x340   : > { %1077 = vadd.xlane.f32.xlu1 %v1076_v33 }
 0x3c9   : > { %v1078_v34 = vpop.xlane.xlu1 %1077 }
 0x3ca   : > { %v1079_v35 = vmul.f32 0.03125, %v1078_v34 }
 0x3cc   : > { %v1080_v36 = vadd.f32 1e-12, %v1079_v35 }
 0x3ce   : > { %2615 = vrsqrt.f32 %v1080_v36 }
 0x3db   : > { %v2616_v37 = vpop.eup %2615 }
 0x3dc   : > { %v1082_v39 = vmul.f32 %v2616_v37, %v1074_v31 }
 0x3de   : > { %v1089_v41 = vmul.f32 %v2277_v38, %v1082_v39 }
 0x3e0   : > { %v1096_v43 = vadd.f32 %v2278_v40, %v1089_v41 }
 0x3e2   : > { %v1098_v44 = vadd.f32 %v1097_v42, %v1096_v43 }
 0x3e4   : > { %1099 = vst.msk [vmem:[%s3346_s4] sm:$0xff] %vm1068_vm2, %v1098_v44 }
 0x3e5 PF: > { %v2617_v45 = vld [vmem:[%s3300_s13 + $0x8] sm:$0xff]   ;;  %v2951_v46 = vmov 0.0   ;;  %v2618_v47 = vld [vmem:[%s3300_s13] sm:$0xff]   ;;  %vm2952_vm3 = vmmov 0   ;;  %vm1128_vm4 = vcmask 261120   ;;  %s3691_s12 = sld [smem:[#allocation43_spill]]  ;;  %v1202_v15 = vlaneseq }
 0x3e6   : > { %2361 = vmatprep.subr.bf16.mxu0 %v2951_v46  ;;  %2369 = vmatprep.subr.bf16.mxu1 %v2951_v46  ;;  %s2953_s16 = smov 104   ;;  %s2954_s9 = smov 120   ;;  %vm1210_vm5 = vcmask 64512   ;;  %vm1457_vm6 = vcmask 1043456   ;;  %vm1658_vm7 = vcmask 130048   ;;  %vm1660_vm8 = vcmask 195584  }
 0x3e7   : > { %2362 = vmatpush3.bf16.msra.mxu0 %v2617_v45  ;;  %2365 = vmatprep.mubr.msk.bf16.mxu0 %vm2952_vm3, %v2951_v46  ;;  %s2955_s7 = smov 112   ;;  %s2956_s8 = smov 96   ;;  %v1203_v18 = vshrl.u32 %v1202_v15, 7  ;;  %vm1894_vm10 = vcmask 523264  }
 0x3e8   : > { %2363 = vmatprep.subr.bf16.mxu0 %v2951_v46  ;;  %2371 = vmatprep.mubr.msk.bf16.mxu1 %vm2952_vm3, %v2951_v46  ;;  %s3693_s28 = sld [smem:[#allocation34_spill]]  ;;  %s2958_s24 = smov 8  }
 0x3e9   : > { %v1204_v20 = vsub.s32 0, %v1203_v18  ;;  %s2959_s6 = smov 16   ;;  %s2960_s26 = smov 24  }
 0x3ea   : > { %s3695_s19 = sld [smem:[#allocation45_spill]] }
 0x3eb   : > { %v3375_v48 = vld [vmem:[%s3346_s4] sm:$0xff]  ;;  %2364 = vmatpush3.bf16.msra.mxu0 %v2618_v47  ;;  %s3692_s21 = scalar_lea.vmem %s3691_s12, %s3286_s18  ;;  %s3697_s12 = sld [smem:[#allocation47_spill]] }
 0x3ec   : > { %v1101_v49 = vpack.c.bf16 %v3375_v48, %v3375_v48  ;;  %2375 = vmatprep.subr.bf16.mxu0 %v2951_v46  ;;  %v2279_v50 = vld [vmem:[%s3692_s21] ss:$0 sm:$0xff]  ;;  %s3705_s15 = sld [smem:[#allocation54_spill]] }
 0x3ee   : > { %2366 = vmatmul.mubr.msk.bf16.vlgmr.msra.gmra.mxu0 %vm1128_vm4, %v1101_v49  ;;  %s3694_s29 = scalar_lea.vmem %s3693_s28, %s3283_s14  ;;  %s2957_s14 = smov 64  }
 0x3ef   : > { %2377 = vmatprep.mubr.msk.bf16.mxu0 %vm2952_vm3, %v2951_v46  ;;  %v1102_v16 = vld [vmem:[%s3694_s29] sm:$0x1] }
 0x3f0   : > { %v1103_v17 = vsub.f32 1.0, %v1102_v16  ;;  %s3696_s1 = scalar_lea.vmem %s3695_s19, %s3286_s18 }
 0x3f1   : > { %s3698_s21 = scalar_lea.vmem %s3697_s12, %s3286_s18  ;;  %s2961_s18 = smov [#allocation13]  }
 0x3f2   : > { %v1104_v19 = vmul.f32 -10000.0, %v1103_v17 }
 0x3f4   : > { %v1205_v21 = vrot.slane %v1104_v19, %v1204_v20 }
 0x4ae   : > { %v1166_v51 = vpop.f32.mrf.mxu0 }
 0x4af   : > { %v1167_v52 = vadd.f32 %v2279_v50, %v1166_v51 }
 0x4b0   : > { %v2367_v53 = vpop.f32.mrf.mxu0 }
 0x4b1   : > { %1194 = vrot.lane.b32.xlu1 %v1167_v52, %s2953_s16  ;;  %1188 = vrot.lane.b32.xlu0 %v1167_v52, %s2954_s9  ;;  %v3391_v55 = vpack.c.bf16 %v1167_v52, %v1167_v52  ;;  %v1172_v57 = vmul.f32 0.35355338, %v1167_v52 }
 0x4b2   : > { %v1169_v54 = vpop.f32.mrf.mxu0 }
 0x4b3   : > { %v1183_v2 = vpack.c.bf16 %v1172_v57, %v1172_v57 }
 0x4b4   : > { %v2368_v56 = vpop.f32.mrf.mxu0 }
 0x4b5   : > { %1191 = vrot.lane.b32.xlu0 %v1167_v52, %s2955_s7  ;;  %1208 = vrot.lane.b32.xlu1 %v3391_v55, %s2956_s8 }
 0x4b9   : > { %1174 = vrot.lane.b32.xlu1 %v1172_v57, %s2954_s9 }
 0x523   : > { %v1195_v58 = vpop.permute.xlu1 %1194  ;;  %v1189_v59 = vpop.permute.xlu0 %1188 }
 0x524   : > { %v3394_v60 = vpack.c.bf16 %v1195_v58, %v1195_v58  ;;  %v3396_v61 = vpack.c.bf16 %v1189_v59, %v1189_v59 }
 0x526   : > { %1258 = vrot.lane.b32.xlu0 %v3396_v61, %s2956_s8  ;;  %1356 = vrot.lane.b32.xlu1 %v3394_v60, %s2956_s8 }
 0x527   : > { %v1192_v62 = vpop.permute.xlu0 %1191  ;;  %v1209_v63 = vpop.permute.xlu1 %1208 }
 0x528   : > { %v3400_v0 = vpack.c.bf16 %v1192_v62, %v1192_v62  ;;  %v1215_v1 = vsel %vm1210_vm5, %v1209_v63, 0 }
 0x529   : > { %2370 = vmatpush3.bf16.xpose.msra.mxu1 %v1215_v1 }
 0x52a   : > { %1307 = vrot.lane.b32.xlu0 %v3400_v0, %s2956_s8  ;;  %1180 = vrot.lane.b32.xlu1 %v1172_v57, %s2953_s16 }
 0x52b   : > { %2381 = vmatprep.subr.bf16.mxu1 %v2951_v46  ;;  %v1175_v5 = vpop.permute.xlu1 %1174 }
 0x52c   : > { %v1184_v9 = vpack.c.bf16 %v1175_v5, %v1175_v5 }
 0x52e   : > { %1177 = vrot.lane.b32.xlu0 %v1172_v57, %s2955_s7 }
 0x530   : > { %2372 = vmatmul.mubr.msk.bf16.vlgmr.msra.gmra.mxu1 %vm1210_vm5, %v1183_v2 }
 0x531   : > { %2383 = vmatprep.mubr.msk.bf16.mxu1 %vm2952_vm3, %v2951_v46 }
 0x598   : > { %v1259_v3 = vpop.permute.xlu0 %1258  ;;  %v1357_v8 = vpop.permute.xlu1 %1356 }
 0x599   : > { %v1264_v4 = vsel %vm1210_vm5, %v1259_v3, 0  ;;  %v1362_v11 = vsel %vm1210_vm5, %v1357_v8, 0 }
 0x59a   : > { %2376 = vmatpush3.bf16.xpose.msra.mxu0 %v1264_v4 }
 0x59b   : > { %2387 = vmatprep.subr.bf16.mxu0 %v2951_v46 }
 0x59c   : > { %v1308_v6 = vpop.permute.xlu0 %1307  ;;  %v1181_v13 = vpop.permute.xlu1 %1180 }
 0x59d   : > { %v1313_v7 = vsel %vm1210_vm5, %v1308_v6, 0  ;;  %v1186_v14 = vpack.c.bf16 %v1181_v13, %v1181_v13 }
 0x59e   : > { %2382 = vmatpush3.bf16.xpose.msra.mxu1 %v1313_v7 }
 0x59f   : > { %2393 = vmatprep.subr.bf16.mxu1 %v2951_v46 }
 0x5a0   : > { %v1178_v10 = vpop.permute.xlu0 %1177 }
 0x5a1   : > { %2378 = vmatmul.mubr.msk.bf16.vlgmr.msra.gmra.mxu0 %vm1210_vm5, %v1184_v9  ;;  %v1185_v12 = vpack.c.bf16 %v1178_v10, %v1178_v10 }
 0x5a2   : > { %2388 = vmatpush3.bf16.xpose.msra.mxu0 %v1362_v11  ;;  %2389 = vmatprep.mubr.msk.bf16.mxu0 %vm2952_vm3, %v2951_v46 }
 0x5a3   : > { %2399 = vmatprep.subr.bf16.mxu0 %v2951_v46 }
 0x5a5   : > { %2384 = vmatmul.mubr.msk.bf16.vlgmr.msra.gmra.mxu1 %vm1210_vm5, %v1185_v12 }
 0x5a6   : > { %2395 = vmatprep.mubr.msk.bf16.mxu1 %vm2952_vm3, %v2951_v46 }
 0x5a9   : > { %2390 = vmatmul.mubr.msk.bf16.vlgmr.msra.gmra.mxu0 %vm1210_vm5, %v1186_v14 }
 0x5aa   : > { %2401 = vmatprep.mubr.msk.bf16.mxu0 %vm2952_vm3, %v2951_v46 }
 0x5f0   : > { %v1251_v22 = vpop.f32.mrf.mxu1 }
 0x5f1   : > { %v1252_v23 = vadd.f32 %v1251_v22, %v1205_v21 }
 0x5f2   : > { %v2373_v24 = vpop.f32.mrf.mxu1 }
 0x5f3   : > { %v1404_v25 = vsel %vm1210_vm5, %v1252_v23, -inf }
 0x5f4   : > { %1405 = vmax.xlane.f32.xlu0 %v1404_v25  ;;  %v1254_v26 = vpop.f32.mrf.mxu1 }
 0x5f6   : > { %v2374_v27 = vpop.f32.mrf.mxu1 }
 0x661   : > { %v1300_v28 = vpop.f32.mrf.mxu0 }
 0x662   : > { %v1301_v29 = vadd.f32 %v1300_v28, %v1205_v21 }
 0x663   : > { %v2379_v30 = vpop.f32.mrf.mxu0 }
 0x664   : > { %v1407_v31 = vsel %vm1210_vm5, %v1301_v29, -inf }
 0x665   : > { %v1349_v32 = vpop.f32.mrf.mxu1  ;;  %1408 = vmax.xlane.f32.xlu1 %v1407_v31  ;;  %v1303_v33 = vpop.f32.mrf.mxu0 }
 0x666   : > { %v1350_v34 = vadd.f32 %v1349_v32, %v1205_v21  ;;  %v2619_v32 = vld [vmem:[%s3309_s2 + $0x8] sm:$0xff]   ;;  %v2620_v33 = vld [vmem:[%s3309_s2] sm:$0xff]  }
 0x667   : > { %v2380_v35 = vpop.f32.mrf.mxu0  ;;  %v2385_v36 = vpop.f32.mrf.mxu1 }
 0x668   : > { %v1410_v37 = vsel %vm1210_vm5, %v1350_v34, -inf }
 0x669   : > { %1411 = vmax.xlane.f32.xlu0 %v1410_v37  ;;  %v1352_v38 = vpop.f32.mrf.mxu1  ;;  %v1398_v39 = vpop.f32.mrf.mxu0 }
 0x66a   : > { %v1399_v40 = vadd.f32 %v1398_v39, %v1205_v21 }
 0x66b   : > { %v2386_v41 = vpop.f32.mrf.mxu1  ;;  %v2391_v42 = vpop.f32.mrf.mxu0 }
 0x66c   : > { %v1413_v43 = vsel %vm1210_vm5, %v1399_v40, -inf }
 0x66d   : > { %1414 = vmax.xlane.f32.xlu0 %v1413_v43  ;;  %v1401_v44 = vpop.f32.mrf.mxu0 }
 0x66f   : > { %v2392_v45 = vpop.f32.mrf.mxu0 }
 0x676   : > { %1452 = vrot.lane.b32.xlu1 %v3391_v55, %s2957_s14 }
 0x67d   : > { %v1406_v47 = vpop.xlane.xlu0 %1405 }
 0x67e   : > { %v1416_v49 = vsub.f32 %v1252_v23, %v1406_v47 }
 0x680   : > { %v1420_v50 = vmul.f32 1.442695, %v1416_v49 }
 0x682   : > { %2627 = vpow2.f32 %v1420_v50 }
 0x68f   : > { %v2628_v51 = vpop.eup %2627 }
 0x690   : > { %v1428_v52 = vsel %vm1210_vm5, %v2628_v51, 0.0 }
 0x69a   : > { %1429 = vadd.xlane.f32.xlu1 %v1428_v52 }
 0x6ee   : > { %v1409_v53 = vpop.xlane.xlu1 %1408 }
 0x6ef   : > { %v1417_v54 = vsub.f32 %v1301_v29, %v1409_v53 }
 0x6f1   : > { %v1422_v56 = vmul.f32 1.442695, %v1417_v54 }
 0x6f2   : > { %v1412_v57 = vpop.xlane.xlu0 %1411  ;;  %v1453_v58 = vpop.permute.xlu1 %1452 }
 0x6f3   : > { %2629 = vpow2.f32 %v1422_v56  ;;  %v1418_v59 = vsub.f32 %v1350_v34, %v1412_v57  ;;  %v1459_v62 = vsel %vm1457_vm6, %v1453_v58, 0  ;;  %v2291_v56 = vld [vmem:[%s3696_s1] ss:$0 sm:$0xff] }
 0x6f4   : > { %2394 = vmatpush3.bf16.msra.mxu1 %v1459_v62 }
 0x6f5   : > { %v1424_v55 = vmul.f32 1.442695, %v1418_v59  ;;  %2405 = vmatprep.subr.bf16.mxu1 %v2951_v46 }
 0x6f6   : > { %v1415_v63 = vpop.xlane.xlu0 %1414 }
 0x6f7   : > { %2631 = vpow2.f32 %v1424_v55  ;;  %v1419_v1 = vsub.f32 %v1399_v40, %v1415_v63 }
 0x6f9   : > { %v1426_v2 = vmul.f32 1.442695, %v1419_v1 }
 0x6fb   : > { %2633 = vpow2.f32 %v1426_v2 }
 0x700   : > { %v2630_v3 = vpop.eup %2629 }
 0x701   : > { %v1431_v4 = vsel %vm1210_vm5, %v2630_v3, 0.0 }
 0x702   : > { %1432 = vadd.xlane.f32.xlu0 %v1431_v4 }
 0x704   : > { %v2632_v5 = vpop.eup %2631 }
 0x705   : > { %v1434_v6 = vsel %vm1210_vm5, %v2632_v5, 0.0 }
 0x706   : > { %1435 = vadd.xlane.f32.xlu1 %v1434_v6 }
 0x708   : > { %v2634_v7 = vpop.eup %2633 }
 0x709   : > { %v1437_v8 = vsel %vm1210_vm5, %v2634_v7, 0.0 }
 0x70a   : > { %1438 = vadd.xlane.f32.xlu0 %v1437_v8  ;;  %v2622_v8 = vld [vmem:[%s3322_s5] sm:$0xff]  }
 0x717   : > { %1549 = vrot.lane.b32.xlu1 %v3400_v0, %s2957_s14 }
 0x71b   : > { %1597 = vrot.lane.b32.xlu1 %v3394_v60, %s2957_s14 }
 0x720   : > { %1501 = vrot.lane.b32.xlu0 %v3396_v61, %s2957_s14 }
 0x723   : > { %v1430_v9 = vpop.xlane.xlu1 %1429 }
 0x724   : > { %2635 = vrcp.f32 %v1430_v9 }
 0x731   : > { %v2636_v10 = vpop.eup %2635 }
 0x732   : > { %v1441_v11 = vmul.f32 %v2636_v10, %v2628_v51 }
 0x734   : > { %v1448_v12 = vpack.c.bf16 %v1441_v11, %v1441_v11 }
 0x736   : > { %2396 = vmatmul.mubr.msk.bf16.vlgmr.msra.gmra.mxu1 %vm1210_vm5, %v1448_v12  ;;  %v2295_v12 = vld [vmem:[%s3271_s20] ss:$0 sm:$0xff] }
 0x737   : > { %2407 = vmatprep.mubr.msk.bf16.mxu1 %vm2952_vm3, %v2951_v46 }
 0x78b   : > { %v1433_v13 = vpop.xlane.xlu0 %1432 }
 0x78c   : > { %2637 = vrcp.f32 %v1433_v13 }
 0x78f   : > { %v1436_v14 = vpop.xlane.xlu1 %1435 }
 0x790   : > { %2639 = vrcp.f32 %v1436_v14  ;;  %v2296_v14 = vld [vmem:[%s3698_s21] ss:$0 sm:$0xff] }
 0x793   : > { %v1550_v0 = vpop.permute.xlu1 %1549  ;;  %v1439_v15 = vpop.xlane.xlu0 %1438 }
 0x794   : > { %v1555_v60 = vsel %vm1457_vm6, %v1550_v0, 0  ;;  %2641 = vrcp.f32 %v1439_v15 }
 0x795   : > { %2406 = vmatpush3.bf16.msra.mxu1 %v1555_v60 }
 0x796   : > { %2417 = vmatprep.subr.bf16.mxu1 %v2951_v46 }
 0x797   : > { %v1502_v61 = vpop.permute.xlu0 %1501  ;;  %v1598_v19 = vpop.permute.xlu1 %1597 }
 0x798   : > { %v1507_v16 = vsel %vm1457_vm6, %v1502_v61, 0  ;;  %v1603_v22 = vsel %vm1457_vm6, %v1598_v19, 0  ;;  %v2623_v61 = vld [vmem:[%s3332_s25 + $0x18] sm:$0xff]   ;;  %v2297_v19 = vld [vmem:[%s938_s3] ss:$0 sm:$0xff] }
 0x799   : > { %v2638_v17 = vpop.eup %2637  ;;  %2400 = vmatpush3.bf16.msra.mxu0 %v1507_v16  ;;  %v2624_v16 = vld [vmem:[%s3332_s25 + $0x10] sm:$0xff]  }
 0x79a   : > { %2411 = vmatprep.subr.bf16.mxu0 %v2951_v46  ;;  %v1443_v18 = vmul.f32 %v2638_v17, %v2630_v3  ;;  %v2625_v17 = vld [vmem:[%s3332_s25 + $0x8] sm:$0xff]  }
 0x79c   : > { %v1449_v20 = vpack.c.bf16 %v1443_v18, %v1443_v18  ;;  %v2626_v18 = vld [vmem:[%s3332_s25] sm:$0xff]  }
 0x79d   : > { %v2640_v21 = vpop.eup %2639 }
 0x79e   : > { %2402 = vmatmul.mubr.msk.bf16.vlgmr.msra.gmra.mxu0 %vm1210_vm5, %v1449_v20  ;;  %v1445_v23 = vmul.f32 %v2640_v21, %v2632_v5 }
 0x79f   : > { %2412 = vmatpush3.bf16.msra.mxu0 %v1603_v22  ;;  %2413 = vmatprep.mubr.msk.bf16.mxu0 %vm2952_vm3, %v2951_v46 }
 0x7a0   : > { %v1450_v24 = vpack.c.bf16 %v1445_v23, %v1445_v23  ;;  %2425 = vmatprep.subr.bf16.mxu0 %v2951_v46 }
 0x7a1   : > { %v2642_v25 = vpop.eup %2641 }
 0x7a2   : > { %2408 = vmatmul.mubr.msk.bf16.vlgmr.msra.gmra.mxu1 %vm1210_vm5, %v1450_v24  ;;  %v1447_v26 = vmul.f32 %v2642_v25, %v2634_v7  ;;  %v2621_v7 = vld [vmem:[%s3322_s5 + $0x8] sm:$0xff]  }
 0x7a3   : > { %2421 = vmatprep.mubr.msk.bf16.mxu1 %vm2952_vm3, %v2951_v46  ;;  %2418 = vmatpush3.bf16.msra.mxu1 %v2619_v32 }
 0x7a4   : > { %v1451_v27 = vpack.c.bf16 %v1447_v26, %v1447_v26  ;;  %2419 = vmatprep.subr.bf16.mxu1 %v2951_v46 }
 0x7a6   : > { %2414 = vmatmul.mubr.msk.bf16.vlgmr.msra.gmra.mxu0 %vm1210_vm5, %v1451_v27 }
 0x7a7   : > { %2429 = vmatprep.mubr.msk.bf16.mxu0 %vm2952_vm3, %v2951_v46  ;;  %2420 = vmatpush3.bf16.msra.mxu1 %v2620_v33 }
 0x7a8   : > { %2433 = vmatprep.subr.bf16.mxu1 %v2951_v46  ;;  %2426 = vmatpush3.bf16.msra.mxu0 %v2621_v7 }
 0x7a9   : > { %2427 = vmatprep.subr.bf16.mxu0 %v2951_v46 }
 0x7ac   : > { %2428 = vmatpush3.bf16.msra.mxu0 %v2622_v8  ;;  %v2307_v8 = vld [vmem:[%s949_s30] ss:$0 sm:$0xff] }
 0x7f6   : > { %v1495_v28 = vpop.f32.mrf.mxu1 }
 0x7f8   : > { %v2397_v29 = vpop.f32.mrf.mxu1 }
 0x7fa   : > { %v1498_v30 = vpop.f32.mrf.mxu1 }
 0x7fc   : > { %v2398_v31 = vpop.f32.mrf.mxu1 }
 0x85e   : > { %v1543_v34 = vpop.f32.mrf.mxu0 }
 0x85f   : > { %1646 = vrot.lane.b32.xlu0 %v1543_v34, %s2958_s24  ;;  %s2310_s24 = sshll.u32 %s2929_s0, 7 }
 0x860   : > { %v2403_v35 = vpop.f32.mrf.mxu0  ;;  %s1981_s19 = scalar_lea.hbm %s3705_s15, %s2310_s24 }
 0x862   : > { %v1546_v36 = vpop.f32.mrf.mxu0  ;;  %v1591_v37 = vpop.f32.mrf.mxu1 }
 0x863   : > { %1650 = vrot.lane.b32.xlu1 %v1591_v37, %s2959_s6  ;;  %s1983_s6 = sshll.u32 %s3346_s4, 4  ;;  %s1984_s6 = int_to_ptr.vmem [resolvable:$true] %s1983_s6 }
 0x864   : > { %v2404_v38 = vpop.f32.mrf.mxu0  ;;  %v2409_v39 = vpop.f32.mrf.mxu1  ;;  %s2809_s30 = scalar_lea.vmem %s1984_s6, 128 }
 0x865   : > { %p2810_p11 = scmp.ne.s32.totalorder %s1984_s6, %s2809_s30 }
 0x866   : > { %v1594_v40 = vpop.f32.mrf.mxu1  ;;  %v1639_v41 = vpop.f32.mrf.mxu0 }
 0x867   : > { %1654 = vrot.lane.b32.xlu0 %v1639_v41, %s2960_s26  ;;  %p2811_p12 = pnand %p2810_p11, %p3232_p3 }
 0x868   : > { %v2410_v42 = vpop.f32.mrf.mxu1  ;;  %v2415_v43 = vpop.f32.mrf.mxu0 }
 0x869   : > { %p2812_p0 = pneg %p2811_p12 }
 0x86a   : > { %v1642_v44 = vpop.f32.mrf.mxu0 }
 0x86c   : > { %v2416_v45 = vpop.f32.mrf.mxu0 }
 0x8d1   : > { %v1647_v47 = vpop.permute.xlu0 %1646 }
 0x8d2   : > { %v1657_v50 = vsel %vm1210_vm5, %v1495_v28, %v1647_v47 }
 0x8d5   : > { %v1651_v49 = vpop.permute.xlu1 %1650 }
 0x8d6   : > { %v1659_v51 = vsel %vm1658_vm7, %v1657_v50, %v1651_v49 }
 0x8d9   : > { %v1655_v52 = vpop.permute.xlu0 %1654 }
 0x8da   : > { %v1661_v53 = vsel %vm1660_vm8, %v1659_v51, %v1655_v52  ;;  %v2301_v52 = vld [vmem:[%s946_s23] ss:$0 sm:$0xff]  ;;  %s3701_s23 = sld [smem:[#allocation20_spill]] }
 0x8db   : > { %v1662_v54 = vpack.c.bf16 %v1661_v53, %v1661_v53 }
 0x8dd   : > { %2422 = vmatmul.mubr.msk.bf16.vlgmr.msra.gmra.mxu1 %vm1128_vm4, %v1662_v54 }
 0x8de   : > { %2441 = vmatprep.mubr.msk.bf16.mxu1 %vm2952_vm3, %v2951_v46  ;;  %2434 = vmatpush3.bf16.msra.mxu1 %v2623_v61 }
 0x8df   : > { %2435 = vmatprep.subr.bf16.mxu1 %v2951_v46 }
 0x8e0   : > { %s3706_s1 = sand.u32 1, %s3701_s23  }
 0x8e1   : > { %s1970_s13 = scalar_lea.sflag [#allocation4], %s3706_s1 }
 0x8e2   : > { %2436 = vmatpush3.bf16.msra.mxu1 %v2624_v16 }
 0x8e3   : > { %2437 = vmatprep.subr.bf16.mxu1 %v2951_v46 }
 0x8e6   : > { %2438 = vmatpush3.bf16.msra.mxu1 %v2625_v17 }
 0x8e7   : > { %2439 = vmatprep.subr.bf16.mxu1 %v2951_v46 }
 0x8ea   : > { %2440 = vmatpush3.bf16.msra.mxu1 %v2626_v18 }
 0x99d   : > { %v1723_v57 = vpop.f32.mrf.mxu1 }
 0x99e   : > { %v1724_v58 = vadd.f32 %v2291_v56, %v1723_v57 }
 0x99f   : > { %v2423_v59 = vpop.f32.mrf.mxu1 }
 0x9a0   : > { %v1729_v62 = vadd.f32 %v1724_v58, %v3375_v48 }
 0x9a1   : > { %v1726_v55 = vpop.f32.mrf.mxu1 }
 0x9a2   : > { %v1732_v63 = vsel %vm1128_vm4, %v1729_v62, 0.0 }
 0x9a3   : > { %1733 = vadd.xlane.f32.xlu1 %v1732_v63  ;;  %v2424_v1 = vpop.f32.mrf.mxu1 }
 0xa2c   : > { %v1734_v2 = vpop.xlane.xlu1 %1733 }
 0xa2d   : > { %v1736_v3 = vmul.f32 0.03125, %v1734_v2 }
 0xa2f   : > { %v1737_v4 = vsub.f32 %v1729_v62, %v1736_v3 }
 0xa31   : > { %v1738_v5 = vmul.f32 %v1737_v4, %v1737_v4 }
 0xa33   : > { %v1739_v6 = vsel %vm1128_vm4, %v1738_v5, 0.0 }
 0xa34   : > { %1740 = vadd.xlane.f32.xlu0 %v1739_v6 }
 0xabd   : > { %v1741_v48 = vpop.xlane.xlu0 %1740 }
 0xabe   : > { %v1742_v9 = vmul.f32 0.03125, %v1741_v48 }
 0xac0   : > { %v1743_v10 = vadd.f32 1e-12, %v1742_v9  ;;  %v2308_v9 = vld [vmem:[%s952_s11] ss:$0 sm:$0xff]  ;;  %s2813_s11 = sshll.u32 %s2961_s18, 4  ;;  %s2814_s11 = int_to_ptr.vmem [resolvable:$false] %s2813_s11 }
 0xac1   : > { %s2815_s0 = scalar_lea.vmem %s2814_s11, 256  ;;  %p2816_p2 = scmp.lt.s32.totalorder %s1984_s6, %s2814_s11 }
 0xac2   : > { %2643 = vrsqrt.f32 %v1743_v10  ;;  %p2817_p1 = scmp.lt.s32.totalorder %s2815_s0, %s2809_s30 }
 0xac4   : > { %p2818_p4 = por %p2817_p1, %p2816_p2 }
 0xac6   : > { %p2819_p7 = pnand %p2818_p4, %p2812_p0 }
 0xacf   : > { %v2644_v11 = vpop.eup %2643 }
 0xad0   : > { %v1745_v13 = vmul.f32 %v2644_v11, %v1737_v4 }
 0xad2   : > { %v1752_v0 = vmul.f32 %v2295_v12, %v1745_v13 }
 0xad4   : > { %v1759_v15 = vadd.f32 %v2296_v14, %v1752_v0 }
 0xad6   : > { %v1760_v60 = vpack.c.bf16 %v1759_v15, %v1759_v15 }
 0xad8   : > { %2430 = vmatmul.mubr.msk.bf16.vlgmr.msra.gmra.mxu0 %vm1128_vm4, %v1760_v60 }
 0xb98   : > { %v1821_v20 = vpop.f32.mrf.mxu0 }
 0xb99   : > { %v1822_v21 = vadd.f32 %v2297_v19, %v1821_v20 }
 0xb9a   : > { %v2431_v22 = vpop.f32.mrf.mxu0 }
 0xb9b   : > { %v1828_v23 = vmul.f32 0.70710677, %v1822_v21  ;;  %v1827_v47 = vmul.f32 0.5, %v1822_v21 }
 0xb9c   : > { %v1824_v24 = vpop.f32.mrf.mxu0 }
 0xb9d   : > { %v1829_v25 = vand.u32 2147483647, %v1828_v23  ;;  %vm1849_vm9 = vcmp.ge.f32.partialorder %v1828_v23, 0.0 }
 0xb9e   : > { %v2432_v26 = vpop.f32.mrf.mxu0 }
 0xb9f   : > { %v1830_v27 = vmul.f32 0.3275911, %v1829_v25  ;;  %v1843_v29 = vsub.f32 0.0, %v1829_v25 }
 0xba1   : > { %v1831_v28 = vadd.f32 1.0, %v1830_v27  ;;  %v1844_v30 = vmul.f32 %v1843_v29, %v1829_v25 }
 0xba3   : > { %2645 = vrcp.f32 %v1831_v28  ;;  %v1845_v32 = vmul.f32 1.442695, %v1844_v30 }
 0xba5   : > { %2647 = vpow2.f32 %v1845_v32 }
 0xbb0   : > { %v2646_v46 = vpop.eup %2645 }
 0xbb1   : > { %v1834_v31 = vmul.f32 1.0614054, %v2646_v46 }
 0xbb2   : > { %v2648_v41 = vpop.eup %2647 }
 0xbb3   : > { %v1835_v33 = vadd.f32 -1.4531521, %v1834_v31 }
 0xbb5   : > { %v1836_v34 = vmul.f32 %v2646_v46, %v1835_v33 }
 0xbb7   : > { %v1837_v35 = vadd.f32 1.4214138, %v1836_v34 }
 0xbb9   : > { %v1838_v36 = vmul.f32 %v2646_v46, %v1837_v35 }
 0xbbb   : > { %v1839_v37 = vadd.f32 -0.28449672, %v1838_v36 }
 0xbbd   : > { %v1840_v38 = vmul.f32 %v2646_v46, %v1839_v37 }
 0xbbf   : > { %v1841_v39 = vadd.f32 0.2548296, %v1840_v38 }
 0xbc1   : > { %v1842_v40 = vmul.f32 %v2646_v46, %v1841_v39 }
 0xbc3   : > { %v1847_v42 = vmul.f32 %v2648_v41, %v1842_v40 }
 0xbc5   : > { %v1848_v43 = vsub.f32 1.0, %v1847_v42 }
 0xbc7   : > { %v1850_v44 = vsub.f32 0.0, %v1848_v43 }
 0xbc9   : > { %v1851_v45 = vsel %vm1849_vm9, %v1848_v43, %v1850_v44 }
 0xbca   : > { %v1852_v49 = vadd.f32 1.0, %v1851_v45 }
 0xbcc   : > { %v1853_v50 = vmul.f32 %v1852_v49, %v1827_v47 }
 0xbce   : > { %v1854_v51 = vpack.c.bf16 %v1853_v50, %v1853_v50 }
 0xbd0   : > { %2442 = vmatmul.mubr.msk.bf16.vlgmr.msra.gmra.mxu1 %vm1894_vm10, %v1854_v51 }
 0xc90   : > { %v1932_v53 = vpop.f32.mrf.mxu1 }
 0xc91   : > { %v1933_v54 = vadd.f32 %v2301_v52, %v1932_v53 }
 0xc92   : > { %v2443_v56 = vpop.f32.mrf.mxu1 }
 0xc93   : > { %v1938_v57 = vadd.f32 %v1933_v54, %v1759_v15 }
 0xc94   : > { %v1935_v58 = vpop.f32.mrf.mxu1 }
 0xc95   : > { %v1941_v59 = vsel %vm1128_vm4, %v1938_v57, 0.0 }
 0xc96   : > { %1942 = vadd.xlane.f32.xlu0 %v1941_v59  ;;  %v2444_v62 = vpop.f32.mrf.mxu1 }
 0xd1f   : > { %v1943_v55 = vpop.xlane.xlu0 %1942 }
 0xd20   : > { %v1944_v63 = vmul.f32 0.03125, %v1943_v55 }
 0xd22   : > { %v1945_v1 = vsub.f32 %v1938_v57, %v1944_v63 }
 0xd24   : > { %v1946_v2 = vmul.f32 %v1945_v1, %v1945_v1 }
 0xd26   : > { %v1947_v3 = vsel %vm1128_vm4, %v1946_v2, 0.0 }
 0xd27   : > { %1948 = vadd.xlane.f32.xlu1 %v1947_v3 }
 0xdb0   : > { %v1949_v4 = vpop.xlane.xlu1 %1948 }
 0xdb1   : > { %v1950_v5 = vmul.f32 0.03125, %v1949_v4 }
 0xdb3   : > { %v1951_v6 = vadd.f32 1e-12, %v1950_v5 }
 0xdb5   : > { %2649 = vrsqrt.f32 %v1951_v6 }
 0xdc2   : > { %v2650_v7 = vpop.eup %2649 }
 0xdc3   : > { %v1953_v48 = vmul.f32 %v2650_v7, %v1945_v1 }
 0xdc5   : > { %v1960_v10 = vmul.f32 %v2307_v8, %v1953_v48 }
 0xdc7   : > { %v1967_v11 = vadd.f32 %v2308_v9, %v1960_v10 }
 0xdc9   : > { %1968 = vst.msk [vmem:[%s3346_s4] sm:$0xff] %vm1128_vm4, %v1967_v11 }
 0xdca   : > { %2822 = shalt.err (!%p2819_p7)
}
 0xdcb   : > { %s2823_s22 = scalar_lea.hbm %s1981_s19, 128  ;;  %s2827_s21 = scalar_lea.hbm %s3705_s15, 256 }
 0xdcc   : > { %p2824_p10 = scmp.ne.s32.totalorder %s1981_s19, %s2823_s22  ;;  %p2828_p9 = scmp.lt.s32.totalorder %s1981_s19, %s3705_s15 }
 0xdcd   : > { %p2829_p13 = scmp.lt.s32.totalorder %s2827_s21, %s2823_s22 }
 0xdce   : > { %p2825_p5 = pnand %p2824_p10, %p3232_p3 }
 0xdcf   : > { %p2830_p11 = por %p2829_p13, %p2828_p9 }
 0xdd0   : > { %p2826_p8 = pneg %p2825_p5 }
 0xdd2   : > { %p2831_p12 = pnand %p2830_p11, %p2826_p8 }
 0xdd4   : > { %2834 = shalt.err (!%p2831_p12)
}
 0xdd5   : > { %2467 = dma.vmem_to_hbm [thread:$0]  (%p3232_p3), %s1984_s6, 128, %s1981_s19, %s1970_s13  }
 0xdd6 PF: > { %s3707_s16 = sld [smem:[#allocation26_spill]] }
 0xdd7   : > { %s3708_s25 = sld [smem:[#allocation19_spill]] }
 0xddc   : > { %p2504_p0 = scmp.ge.s32.totalorder %s3707_s16, 2 }
 0xddd   : > { %s1995_s9 = sand.u32 1, %s3708_s25  }
 0xdde   : > { %p2490_p2 = pnand %p2504_p0, %p3238_p6  ;;  %s1996_s23 = scalar_lea.sflag [#allocation4], %s1995_s9 }
 0xde0   : > { %p2491_p1 = pneg %p2490_p2 }
 0xde2   : > { %2896 = dma.done.wait (%p2491_p1), %s1996_s23, 128  }
 0xde3   : > { %2898 = vsyncadd (%p2491_p1), %s1996_s23, 4294967168  ;;  %s40_s5 = sadd.s32 1, %s3707_s16   ;;  %s3710_s2 = sld [smem:[#allocation20_spill]] }
 0xde4   : > { %p37_p4 = scmp.ge.s32.totalorder %s40_s5, 6   ;;  %s3711_s25 = sld [smem:[#allocation21_spill]] }
 0xde5   : > { %s3712_s26 = sld [smem:[#allocation30_spill]] }
 0xde6   : > { %s3713_s27 = sld [smem:[#allocation22_spill]] }
 0xde7   : > { %s3714_s3 = sld [smem:[#allocation23_spill]] }
 0xde8   : > { %s3715_s28 = sld [smem:[#allocation29_spill]]  ;;  %39 = sbr.rel (!%p37_p4) target bundleno = 35 (0x23), region = 213 }
 0xde9   : > { %s3716_s29 = sld [smem:[#allocation24_spill]] }
 0xdea   : > { %s3717_s0 = sld [smem:[#allocation25_spill]] }
 0xdeb   : > { %s3718_s4 = sld [smem:[#allocation27_spill]] }
 0xdec   : > { %s3719_s30 = sld [smem:[#allocation28_spill]] }
 0xded   :  { %2001 = vsyncpa [#allocation3], 1 }
 0xdee   :  { %2003 = vsyncpa [#allocation3 + $0x1], 1 }
 0xdef   :  { %2004 = vsyncpa [#allocation6], 1 }
 0xdf0   :  { %2005 = vsyncpa [#allocation9], 1 }
 0xdf1   :  { %2006 = vsyncpa [#allocation12], 1 }
 0xdf2   :  { %2008 = vsyncpa [#allocation12 + $0x1], 1 }
 0xdf3   :  { %2009 = vsyncpa [#allocation4], 1 }
 0xdf4   :  { %2011 = vsyncpa [#allocation4 + $0x1], 1 }

</bundles_post_ra>
